<compile_context>
chip_gen: v7x
topology: tpu7x:2x2x1
jax: 0.10.0
libtpu: 0.0.40
codegen_flags: <defaults>
</compile_context>

<pallas_src>
import functools
import math

import jax
import jax.numpy as jnp
from jax.experimental import pallas as pl
from jax.experimental.pallas import tpu as pltpu

_GELU_C = math.sqrt(2.0 / math.pi)


# --------------------------------------------------------------------------- #
# Fused transformer-stack kernel.  Grid = (batch_tiles, n_layers).
# --------------------------------------------------------------------------- #
def _layer_norm(v, g, b):
    # BERT-pytorch custom LayerNorm: unbiased std, eps added to the *std*
    # (intentionally NOT rsqrt(var + eps) — matches the reference numerics).
    mean = jnp.mean(v, axis=-1, keepdims=True)
    var = jnp.sum((v - mean) ** 2, axis=-1, keepdims=True) / (v.shape[-1] - 1)
    inv = pl.reciprocal(jnp.sqrt(var) + 1e-6, approx=True)   # EUP slot
    return g * (v - mean) * inv + b


def _stack_kernel(
    x_ref, bias_ref,
    wqkv_ref, bqkv_ref, wo_ref, bo_ref,
    g1_ref, be1_ref,
    w1_ref, b1_ref, w2_ref, b2_ref,
    g2_ref, be2_ref,
    o_ref,
    *, num_heads,
):
    layer = pl.program_id(1)
    rows, hidden = x_ref.shape            # (Bt*S, H)
    bt, _, seq = bias_ref.shape           # (Bt, 1, S)
    nh = num_heads
    dk = hidden // nh
    bf16 = jnp.bfloat16
    f32 = jnp.float32

    # The residual stream lives in the output VMEM block across the layer axis
    # (its block index ignores `layer`), so HBM is written only once per tile.
    @pl.when(layer == 0)
    def _():
        o_ref[...] = x_ref[...]

    x = o_ref[...]                        # (Bt*S, H) f32 residual stream
    bias = bias_ref[...]                  # (Bt, 1, S): 0.0 = valid key, -1e9 = pad

    # ---------------- multi-head self-attention sublayer (pre-norm) ----------
    xn = _layer_norm(x, g1_ref[0], be1_ref[0]).astype(bf16)
    # Fused QKV projection: single full-lane-width MXU pass; 1/sqrt(dk) is
    # already folded into the Q columns / Q bias by the wrapper.
    qkv = jnp.dot(xn, wqkv_ref[0], preferred_element_type=f32) + bqkv_ref[0]

    def to_heads_ds(t):                   # (Bt*S, H) -> (Bt*nh, dk, S)
        t = t.reshape(bt, seq, hidden)            # sublane-tile-aligned split
        t = jnp.swapaxes(t, 1, 2)                 # last-two-dim transpose
        return t.reshape(bt * nh, dk, seq)        # tile-aligned head split

    # K and V are produced directly in (heads, dk, S) layout so the score and
    # context contractions are the standard NN / NT batched-matmul forms.
    q = jnp.swapaxes(to_heads_ds(qkv[:, :hidden]), 1, 2)      # (Bt*nh, S, dk)
    kT = to_heads_ds(qkv[:, hidden:2 * hidden])                # (Bt*nh, dk, S)
    vT = to_heads_ds(qkv[:, 2 * hidden:])                      # (Bt*nh, dk, S)

    scores = jnp.einsum("bqd,bdk->bqk", q.astype(bf16), kT.astype(bf16),
                        preferred_element_type=f32)            # (Bt*nh, S, S)
    # Additive key-padding bias: one VPU add (no compare/select).  Fully padded
    # rows see every score == -1e9 and fall back to uniform attention, matching
    # the reference masked_fill + softmax behaviour.
    scores = scores.reshape(bt, nh, seq, seq) + bias[:, None, :, :]
    scores = scores - jnp.max(scores, axis=-1, keepdims=True)  # f32 softmax
    p = jnp.exp(scores)
    p = p * pl.reciprocal(jnp.sum(p, axis=-1, keepdims=True), approx=True)
    p = p.reshape(bt * nh, seq, seq)

    # ctx^T = V^T @ P^T lands head-major and reshapes straight back into the
    # concat-heads (Bt*S, H) layout for the output projection.
    ctxT = jnp.einsum("bdk,bqk->bdq", vT.astype(bf16), p.astype(bf16),
                      preferred_element_type=f32)              # (Bt*nh, dk, S)
    ctx = jnp.swapaxes(ctxT.reshape(bt, hidden, seq), 1, 2).reshape(rows, hidden)

    # Output projection: a single full-depth (K = H) contraction over all heads.
    attn = jnp.dot(ctx.astype(bf16), wo_ref[0],
                   preferred_element_type=f32) + bo_ref[0]
    x1 = x + attn                                 # dropout == identity (eval)

    # ---------------- position-wise feed-forward sublayer (pre-norm) ---------
    xn2 = _layer_norm(x1, g2_ref[0], be2_ref[0]).astype(bf16)
    h1 = jnp.dot(xn2, w1_ref[0], preferred_element_type=f32) + b1_ref[0]
    gelu = 0.5 * h1 * (1.0 + jnp.tanh(_GELU_C * (h1 + 0.044715 * h1 * h1 * h1)))
    ff = jnp.dot(gelu.astype(bf16), w2_ref[0],
                 preferred_element_type=f32) + b2_ref[0]

    o_ref[...] = x1 + ff                          # dropout == identity (eval)


# --------------------------------------------------------------------------- #
# Wrapper: stack per-layer weights, pick tiling, launch one fused pallas_call.
# --------------------------------------------------------------------------- #
def _pick_vmem_limit():
    # Size the scoped-VMEM request per generation instead of hardcoding 64 MiB:
    # ~3/4 of physical capacity, capped (v5e/v6e: 128 MiB -> 96 MiB,
    # v7x: 64 MiB -> 48 MiB), leaving headroom for compiler-internal scratch.
    try:
        cap = int(pltpu.get_tpu_info().vmem_capacity_bytes)
    except Exception:
        return 32 * 1024 * 1024           # conservative, compile-safe fallback
    return min(cap * 3 // 4, 100 * 1024 * 1024)


def _pick_batch_tile(batch, seq, rows_target=256):
    # Pack batch elements so every LN / QKV / FFN matmul has bt*seq rows
    # (>=128 fills v5e's MXU, >=256 fills the 256-row v6e/v7x MXU).
    bt = min(batch, max(1, -(-rows_target // seq)))
    # v7x megacore: prefer >=2 steps on the parallel grid axis for its two
    # TensorCores — but only when halving still leaves full-height tiles.
    if batch // bt < 2 and batch >= 2 and (batch // 2) * seq >= rows_target:
        bt = batch // 2
    while batch % bt:                     # bt must divide the batch
        bt -= 1
    return bt


def transformer_stack(x, mask_bias, layer_params, *, num_heads):
    B, S, H = x.shape
    L = len(layer_params)
    dk = H // num_heads
    assert H % num_heads == 0 and dk % 8 == 0 and S % 8 == 0
    scale = 1.0 / math.sqrt(dk)
    bf16 = jnp.bfloat16

    def stk(fn, dtype=jnp.float32):
        return jnp.stack([fn(p) for p in layer_params]).astype(dtype)

    # Per-layer weights stacked on a leading L axis.  bf16 weights halve the
    # HBM->VMEM DMA and feed the MXU bf16 path (f32 accumulation in-kernel).
    # TODO(synk): an fp8 weight path would halve DMA again on v7x (needs scales).
    wqkv = stk(lambda p: jnp.concatenate(
        [p["wq"] * scale, p["wk"], p["wv"]], axis=1), bf16)         # (L, H, 3H)
    bqkv = stk(lambda p: jnp.concatenate(
        [p["bq"] * scale, p["bk"], p["bv"]])[None, :])              # (L, 1, 3H)
    wo = stk(lambda p: p["wo"], bf16)                               # (L, H, H)
    bo = stk(lambda p: p["bo"][None, :])
    g1 = stk(lambda p: p["ln1_g"][None, :])
    be1 = stk(lambda p: p["ln1_b"][None, :])
    w1 = stk(lambda p: p["w_ff1"], bf16)                            # (L, H, FF)
    b1 = stk(lambda p: p["b_ff1"][None, :])
    w2 = stk(lambda p: p["w_ff2"], bf16)                            # (L, FF, H)
    b2 = stk(lambda p: p["b_ff2"][None, :])
    g2 = stk(lambda p: p["ln2_g"][None, :])
    be2 = stk(lambda p: p["ln2_b"][None, :])

    bt = _pick_batch_tile(B, S)
    n_bt = B // bt
    rows = bt * S

    x2 = x.reshape(B * S, H)              # lane-dense (., H) activation slab

    act_spec = pl.BlockSpec((rows, H), lambda b, l: (b, 0))
    bias_spec = pl.BlockSpec((bt, 1, S), lambda b, l: (b, 0, 0))

    def wspec(a):
        # Layer-indexed weight slab.  Its index map depends on `l`, so the
        # default double-buffering overlaps layer l+1's weight DMA with layer
        # l's compute.  (At production sizes on v7x, drop to pl.Buffered(1)
        # via pipeline_mode= if the doubled footprint overruns 64 MiB VMEM.)
        return pl.BlockSpec((1,) + a.shape[1:], lambda b, l: (l, 0, 0))

    weights = [wqkv, bqkv, wo, bo, g1, be1, w1, b1, w2, b2, g2, be2]

    out = pl.pallas_call(
        functools.partial(_stack_kernel, num_heads=num_heads),
        out_shape=jax.ShapeDtypeStruct((B * S, H), jnp.float32),
        grid=(n_bt, L),
        in_specs=[act_spec, bias_spec] + [wspec(w) for w in weights],
        out_specs=act_spec,
        compiler_params=pltpu.CompilerParams(
            dimension_semantics=("parallel", "arbitrary"),
            vmem_limit_bytes=_pick_vmem_limit(),
        ),
    )(x2, mask_bias, *weights)
    return out.reshape(B, S, H)


# --------------------------------------------------------------------------- #
# Full BERTTE forward.
# --------------------------------------------------------------------------- #
def bert_te_forward(token_seq, time_seq, params):
    B, S = token_seq.shape
    num_heads = params["num_heads"]

    # Additive key-padding bias (0 for valid keys, -1e9 for padding).  The
    # reference's (B, 1, S, S) boolean mask is never materialized.
    key_valid = (token_seq > 0).astype(jnp.float32)
    mask_bias = ((key_valid - 1.0) * 1e9).reshape(B, 1, S)

    # ---- BERTEmbedding (token + position + time); dropout = identity ----
    # TODO(synk): the token-embedding gather has no rectangular-tile Pallas
    # form; it and the tiny (K = expand = 8) time projection stay in XLA.
    tok = jnp.take(params["token_emb"], token_seq, axis=0)           # (B, S, H)
    pos = params["pos_emb"][:S][None, :, :]                          # (1, S, H)
    basis = jnp.sin(
        time_seq[..., None] * params["time_freq"][None, None, :]
        + params["time_phase"][None, None, :]
    )                                                                # (B, S, E)
    t_emb = basis @ params["time_w"] + params["time_b"]              # (B, S, H)
    x = tok + pos + t_emb

    # ---- fused transformer stack: one pallas_call runs every layer ----
    return transformer_stack(x, mask_bias, params["layers"], num_heads=num_heads)


# --------------------------------------------------------------------------- #
# Deterministic parameter construction.
# --------------------------------------------------------------------------- #
def init_params(key, *, vocab, expand, hidden, n_layers, heads, max_len=64):
    ff = hidden * 4
    scale = 0.02
    keys = jax.random.split(key, 4 + n_layers)

    tok = jax.random.normal(keys[0], (vocab, hidden), jnp.float32) * scale
    tok = tok.at[0].set(0.0)  # padding_idx = 0

    position = jnp.arange(max_len, dtype=jnp.float32)[:, None]
    div = jnp.exp(
        jnp.arange(0, hidden, 2, dtype=jnp.float32) * -(math.log(10000.0) / hidden)
    )
    pe = jnp.zeros((max_len, hidden), jnp.float32)
    pe = pe.at[:, 0::2].set(jnp.sin(position * div))
    pe = pe.at[:, 1::2].set(jnp.cos(position * div))

    time_freq = jax.random.normal(keys[1], (expand,), jnp.float32)
    time_phase = jax.random.normal(keys[2], (expand,), jnp.float32)
    time_w = jax.random.normal(keys[3], (expand, hidden), jnp.float32) * scale
    time_b = jnp.zeros((hidden,), jnp.float32)

    layers = []
    for i in range(n_layers):
        lk = jax.random.split(keys[4 + i], 6)
        layers.append(dict(
            wq=jax.random.normal(lk[0], (hidden, hidden), jnp.float32) * scale,
            bq=jnp.zeros((hidden,), jnp.float32),
            wk=jax.random.normal(lk[1], (hidden, hidden), jnp.float32) * scale,
            bk=jnp.zeros((hidden,), jnp.float32),
            wv=jax.random.normal(lk[2], (hidden, hidden), jnp.float32) * scale,
            bv=jnp.zeros((hidden,), jnp.float32),
            wo=jax.random.normal(lk[3], (hidden, hidden), jnp.float32) * scale,
            bo=jnp.zeros((hidden,), jnp.float32),
            ln1_g=jnp.ones((hidden,), jnp.float32),
            ln1_b=jnp.zeros((hidden,), jnp.float32),
            w_ff1=jax.random.normal(lk[4], (hidden, ff), jnp.float32) * scale,
            b_ff1=jnp.zeros((ff,), jnp.float32),
            w_ff2=jax.random.normal(lk[5], (ff, hidden), jnp.float32) * scale,
            b_ff2=jnp.zeros((hidden,), jnp.float32),
            ln2_g=jnp.ones((hidden,), jnp.float32),
            ln2_b=jnp.zeros((hidden,), jnp.float32),
        ))

    return dict(
        token_emb=tok, pos_emb=pe,
        time_freq=time_freq, time_phase=time_phase,
        time_w=time_w, time_b=time_b,
        layers=layers, num_heads=heads,
    )


if __name__ == "__main__":
    B, S = 2, 8
    HIDDEN, HEADS, LAYERS = 128, 4, 2   # H = 128 -> lane-dense (., H) blocks
    VOCAB, EXPAND = 50, 8

    root = jax.random.PRNGKey(0)
    k_par, k_tok, k_time = jax.random.split(root, 3)
    params = init_params(
        k_par, vocab=VOCAB, expand=EXPAND, hidden=HIDDEN,
        n_layers=LAYERS, heads=HEADS, max_len=64,
    )

    token_seq = jax.random.randint(k_tok, (B, S), 0, VOCAB, dtype=jnp.int32)
    time_seq = jax.random.uniform(k_time, (B, S), dtype=jnp.float32) * 10.0

    out = bert_te_forward(token_seq, time_seq, params)
    jax.block_until_ready(out)
    assert out.shape == (B, S, HIDDEN) and out.dtype == jnp.float32
    assert bool(jnp.all(jnp.isfinite(out)))
    print("KERNEL_OK")
</pallas_src>

<mosaic_0001>
module attributes {stable_mosaic.version = 11 : i64} {
  func.func @_stack_kernel(%arg0: i32, %arg1: i32, %arg2: memref<16x128xf32, #tpu.memory_space<vmem>>, %arg3: memref<2x1x8xf32, #tpu.memory_space<vmem>>, %arg4: memref<1x128x384xbf16, #tpu.memory_space<vmem>>, %arg5: memref<1x1x384xf32, #tpu.memory_space<vmem>>, %arg6: memref<1x128x128xbf16, #tpu.memory_space<vmem>>, %arg7: memref<1x1x128xf32, #tpu.memory_space<vmem>>, %arg8: memref<1x1x128xf32, #tpu.memory_space<vmem>>, %arg9: memref<1x1x128xf32, #tpu.memory_space<vmem>>, %arg10: memref<1x128x512xbf16, #tpu.memory_space<vmem>>, %arg11: memref<1x1x512xf32, #tpu.memory_space<vmem>>, %arg12: memref<1x512x128xbf16, #tpu.memory_space<vmem>>, %arg13: memref<1x1x128xf32, #tpu.memory_space<vmem>>, %arg14: memref<1x1x128xf32, #tpu.memory_space<vmem>>, %arg15: memref<1x1x128xf32, #tpu.memory_space<vmem>>, %arg16: memref<16x128xf32, #tpu.memory_space<vmem>>) attributes {dimension_semantics = [#tpu.dimension_semantics<parallel>, #tpu.dimension_semantics<arbitrary>], iteration_bounds = array<i64: 1, 2>, scalar_prefetch = 0 : i64, scratch_operands = 0 : i64, tpu.core_type = #tpu.core_type<tc>, window_params = [{transform_indices = @transform_0, window_bounds = array<i64: 16, 128>}, {transform_indices = @transform_1, window_bounds = array<i64: 2, 1, 8>}, {transform_indices = @transform_2, window_bounds = array<i64: 1, 128, 384>}, {transform_indices = @transform_3, window_bounds = array<i64: 1, 1, 384>}, {transform_indices = @transform_4, window_bounds = array<i64: 1, 128, 128>}, {transform_indices = @transform_5, window_bounds = array<i64: 1, 1, 128>}, {transform_indices = @transform_6, window_bounds = array<i64: 1, 1, 128>}, {transform_indices = @transform_7, window_bounds = array<i64: 1, 1, 128>}, {transform_indices = @transform_8, window_bounds = array<i64: 1, 128, 512>}, {transform_indices = @transform_9, window_bounds = array<i64: 1, 1, 512>}, {transform_indices = @transform_10, window_bounds = array<i64: 1, 512, 128>}, {transform_indices = @transform_11, window_bounds = array<i64: 1, 1, 128>}, {transform_indices = @transform_12, window_bounds = array<i64: 1, 1, 128>}, {transform_indices = @transform_13, window_bounds = array<i64: 1, 1, 128>}, {transform_indices = @transform_14, window_bounds = array<i64: 16, 128>}]} {
    %c0_i32 = arith.constant 0 : i32
    %0 = arith.cmpi eq, %arg1, %c0_i32 : i32
    %1 = arith.extui %0 : i1 to i32
    %c0_i32_0 = arith.constant 0 : i32
    %2 = arith.cmpi ne, %1, %c0_i32_0 : i32
    scf.if %2 {
      %c0_64 = arith.constant 0 : index
      %c0_65 = arith.constant 0 : index
      %144 = vector.load %arg2[%c0_64, %c0_65] : memref<16x128xf32, #tpu.memory_space<vmem>>, vector<16x128xf32>
      %c0_66 = arith.constant 0 : index
      %c0_67 = arith.constant 0 : index
      %145 = vector.load %arg16[%c0_66, %c0_67] : memref<16x128xf32, #tpu.memory_space<vmem>>, vector<16x128xf32>
      tpu.vector_store %arg16[%c0_66, %c0_67], %144 {strides = array<i32>} : memref<16x128xf32, #tpu.memory_space<vmem>>, vector<16x128xf32>,
    } else {
    }
    %c0 = arith.constant 0 : index
    %c0_1 = arith.constant 0 : index
    %3 = vector.load %arg16[%c0, %c0_1] : memref<16x128xf32, #tpu.memory_space<vmem>>, vector<16x128xf32>
    %c0_2 = arith.constant 0 : index
    %c0_3 = arith.constant 0 : index
    %c0_4 = arith.constant 0 : index
    %4 = vector.load %arg3[%c0_2, %c0_3, %c0_4] : memref<2x1x8xf32, #tpu.memory_space<vmem>>, vector<2x1x8xf32>
    %c0_5 = arith.constant 0 : index
    %c0_6 = arith.constant 0 : index
    %c0_7 = arith.constant 0 : index
    %5 = vector.load %arg8[%c0_5, %c0_6, %c0_7] : memref<1x1x128xf32, #tpu.memory_space<vmem>>, vector<1x1x128xf32>
    %6 = vector.shape_cast %5 : vector<1x1x128xf32> to vector<1x128xf32>
    %c0_8 = arith.constant 0 : index
    %c0_9 = arith.constant 0 : index
    %c0_10 = arith.constant 0 : index
    %7 = vector.load %arg9[%c0_8, %c0_9, %c0_10] : memref<1x1x128xf32, #tpu.memory_space<vmem>>, vector<1x1x128xf32>
    %8 = vector.shape_cast %7 : vector<1x1x128xf32> to vector<1x128xf32>
    %cst = arith.constant dense<0.000000e+00> : vector<16xf32>
    %9 = vector.multi_reduction <add>, %3, %cst [1] : vector<16x128xf32> to vector<16xf32>
    %10 = vector.shape_cast %9 : vector<16xf32> to vector<16x1xf32>
    %cst_11 = arith.constant 1.280000e+02 : f32
    %11 = vector.broadcast %cst_11 : f32 to vector<16x1xf32>
    %12 = arith.divf %10, %11 : vector<16x1xf32>
    %13 = vector.broadcast %12 : vector<16x1xf32> to vector<16x128xf32>
    %14 = arith.subf %3, %13 : vector<16x128xf32>
    %15 = arith.mulf %14, %14 : vector<16x128xf32>
    %cst_12 = arith.constant dense<0.000000e+00> : vector<16xf32>
    %16 = vector.multi_reduction <add>, %15, %cst_12 [1] : vector<16x128xf32> to vector<16xf32>
    %17 = vector.shape_cast %16 : vector<16xf32> to vector<16x1xf32>
    %cst_13 = arith.constant 1.270000e+02 : f32
    %18 = vector.broadcast %cst_13 : f32 to vector<16x1xf32>
    %19 = arith.divf %17, %18 : vector<16x1xf32>
    %20 = math.sqrt %19 : vector<16x1xf32>
    %cst_14 = arith.constant 9.99999997E-7 : f32
    %21 = vector.broadcast %cst_14 : f32 to vector<16x1xf32>
    %22 = arith.addf %20, %21 : vector<16x1xf32>
    %23 = tpu.reciprocal %22 {approx = true} : vector<16x1xf32> -> vector<16x1xf32>
    %24 = vector.broadcast %12 : vector<16x1xf32> to vector<16x128xf32>
    %25 = arith.subf %3, %24 : vector<16x128xf32>
    %26 = vector.broadcast %6 : vector<1x128xf32> to vector<16x128xf32>
    %27 = arith.mulf %26, %25 : vector<16x128xf32>
    %28 = vector.broadcast %23 : vector<16x1xf32> to vector<16x128xf32>
    %29 = arith.mulf %27, %28 : vector<16x128xf32>
    %30 = vector.broadcast %8 : vector<1x128xf32> to vector<16x128xf32>
    %31 = arith.addf %29, %30 : vector<16x128xf32>
    %32 = arith.truncf %31 : vector<16x128xf32> to vector<16x128xbf16>
    %c0_15 = arith.constant 0 : index
    %c0_16 = arith.constant 0 : index
    %c0_17 = arith.constant 0 : index
    %33 = vector.load %arg4[%c0_15, %c0_16, %c0_17] : memref<1x128x384xbf16, #tpu.memory_space<vmem>>, vector<1x128x384xbf16>
    %34 = vector.shape_cast %33 : vector<1x128x384xbf16> to vector<128x384xbf16>
    %cst_18 = arith.constant dense<0.000000e+00> : vector<16x384xf32>
    %35 = tpu.matmul %32, %34, %cst_18 {dimension_numbers = #tpu.dot_dimension_numbers<[1], [0], [0], [1], [0, 0, 1, 1], [], []>} : vector<16x128xbf16>, vector<128x384xbf16>, vector<16x384xf32> -> vector<16x384xf32>
    %c0_19 = arith.constant 0 : index
    %c0_20 = arith.constant 0 : index
    %c0_21 = arith.constant 0 : index
    %36 = vector.load %arg5[%c0_19, %c0_20, %c0_21] : memref<1x1x384xf32, #tpu.memory_space<vmem>>, vector<1x1x384xf32>
    %37 = vector.shape_cast %36 : vector<1x1x384xf32> to vector<1x384xf32>
    %38 = vector.broadcast %37 : vector<1x384xf32> to vector<16x384xf32>
    %39 = arith.addf %35, %38 : vector<16x384xf32>
    %40 = vector.extract_strided_slice %39 {offsets = [0, 0], sizes = [16, 128], strides = [1, 1]} : vector<16x384xf32> to vector<16x128xf32>
    %41 = vector.shape_cast %40 : vector<16x128xf32> to vector<2x8x128xf32>
    %42 = tpu.transpose %41, [0, 2, 1] : vector<2x8x128xf32> -> vector<2x128x8xf32>
    %43 = vector.shape_cast %42 : vector<2x128x8xf32> to vector<8x32x8xf32>
    %44 = tpu.transpose %43, [0, 2, 1] : vector<8x32x8xf32> -> vector<8x8x32xf32>
    %45 = vector.extract_strided_slice %39 {offsets = [0, 128], sizes = [16, 128], strides = [1, 1]} : vector<16x384xf32> to vector<16x128xf32>
    %46 = vector.shape_cast %45 : vector<16x128xf32> to vector<2x8x128xf32>
    %47 = tpu.transpose %46, [0, 2, 1] : vector<2x8x128xf32> -> vector<2x128x8xf32>
    %48 = vector.shape_cast %47 : vector<2x128x8xf32> to vector<8x32x8xf32>
    %49 = vector.extract_strided_slice %39 {offsets = [0, 256], sizes = [16, 128], strides = [1, 1]} : vector<16x384xf32> to vector<16x128xf32>
    %50 = vector.shape_cast %49 : vector<16x128xf32> to vector<2x8x128xf32>
    %51 = tpu.transpose %50, [0, 2, 1] : vector<2x8x128xf32> -> vector<2x128x8xf32>
    %52 = vector.shape_cast %51 : vector<2x128x8xf32> to vector<8x32x8xf32>
    %53 = arith.truncf %44 : vector<8x8x32xf32> to vector<8x8x32xbf16>
    %54 = arith.truncf %48 : vector<8x32x8xf32> to vector<8x32x8xbf16>
    "tpu.trace_start"() <{level = 10 : i32, message = "bqd,bdk->bqk"}> : () -> ()
    %cst_22 = arith.constant dense<0.000000e+00> : vector<8x8x8xf32>
    %55 = tpu.matmul %53, %54, %cst_22 {dimension_numbers = #tpu.dot_dimension_numbers<[2], [1], [1], [2], [0, 0, 0, 1, 1, 2], [0], [0]>} : vector<8x8x32xbf16>, vector<8x32x8xbf16>, vector<8x8x8xf32> -> vector<8x8x8xf32>
    "tpu.trace_stop"() : () -> ()
    %56 = vector.shape_cast %55 : vector<8x8x8xf32> to vector<2x4x8x8xf32>
    %57 = vector.shape_cast %4 : vector<2x1x8xf32> to vector<2x1x1x8xf32>
    %58 = vector.broadcast %57 : vector<2x1x1x8xf32> to vector<2x4x8x8xf32>
    %59 = arith.addf %56, %58 : vector<2x4x8x8xf32>
    %cst_23 = arith.constant dense<0xFF800000> : vector<2x4x8xf32>
    %60 = vector.multi_reduction <maximumf>, %59, %cst_23 [3] : vector<2x4x8x8xf32> to vector<2x4x8xf32>
    %61 = vector.shape_cast %60 : vector<2x4x8xf32> to vector<2x4x8x1xf32>
    %62 = vector.broadcast %61 : vector<2x4x8x1xf32> to vector<2x4x8x8xf32>
    %63 = arith.subf %59, %62 : vector<2x4x8x8xf32>
    %64 = math.exp %63 : vector<2x4x8x8xf32>
    %cst_24 = arith.constant dense<0.000000e+00> : vector<2x4x8xf32>
    %65 = vector.multi_reduction <add>, %64, %cst_24 [3] : vector<2x4x8x8xf32> to vector<2x4x8xf32>
    %66 = vector.shape_cast %65 : vector<2x4x8xf32> to vector<2x4x8x1xf32>
    %67 = tpu.reciprocal %66 {approx = true} : vector<2x4x8x1xf32> -> vector<2x4x8x1xf32>
    %68 = vector.broadcast %67 : vector<2x4x8x1xf32> to vector<2x4x8x8xf32>
    %69 = arith.mulf %64, %68 : vector<2x4x8x8xf32>
    %70 = vector.shape_cast %69 : vector<2x4x8x8xf32> to vector<8x8x8xf32>
    %71 = arith.truncf %52 : vector<8x32x8xf32> to vector<8x32x8xbf16>
    %72 = arith.truncf %70 : vector<8x8x8xf32> to vector<8x8x8xbf16>
    "tpu.trace_start"() <{level = 10 : i32, message = "bdk,bqk->bdq"}> : () -> ()
    %cst_25 = arith.constant dense<0.000000e+00> : vector<8x32x8xf32>
    %73 = tpu.matmul %71, %72, %cst_25 {dimension_numbers = #tpu.dot_dimension_numbers<[2], [2], [1], [1], [0, 0, 0, 1, 1, 1], [0], [0]>} : vector<8x32x8xbf16>, vector<8x8x8xbf16>, vector<8x32x8xf32> -> vector<8x32x8xf32>
    "tpu.trace_stop"() : () -> ()
    %74 = vector.shape_cast %73 : vector<8x32x8xf32> to vector<2x128x8xf32>
    %75 = tpu.transpose %74, [0, 2, 1] : vector<2x128x8xf32> -> vector<2x8x128xf32>
    %76 = vector.shape_cast %75 : vector<2x8x128xf32> to vector<16x128xf32>
    %77 = arith.truncf %76 : vector<16x128xf32> to vector<16x128xbf16>
    %c0_26 = arith.constant 0 : index
    %c0_27 = arith.constant 0 : index
    %c0_28 = arith.constant 0 : index
    %78 = vector.load %arg6[%c0_26, %c0_27, %c0_28] : memref<1x128x128xbf16, #tpu.memory_space<vmem>>, vector<1x128x128xbf16>
    %79 = vector.shape_cast %78 : vector<1x128x128xbf16> to vector<128x128xbf16>
    %cst_29 = arith.constant dense<0.000000e+00> : vector<16x128xf32>
    %80 = tpu.matmul %77, %79, %cst_29 {dimension_numbers = #tpu.dot_dimension_numbers<[1], [0], [0], [1], [0, 0, 1, 1], [], []>} : vector<16x128xbf16>, vector<128x128xbf16>, vector<16x128xf32> -> vector<16x128xf32>
    %c0_30 = arith.constant 0 : index
    %c0_31 = arith.constant 0 : index
    %c0_32 = arith.constant 0 : index
    %81 = vector.load %arg7[%c0_30, %c0_31, %c0_32] : memref<1x1x128xf32, #tpu.memory_space<vmem>>, vector<1x1x128xf32>
    %82 = vector.shape_cast %81 : vector<1x1x128xf32> to vector<1x128xf32>
    %83 = vector.broadcast %82 : vector<1x128xf32> to vector<16x128xf32>
    %84 = arith.addf %80, %83 : vector<16x128xf32>
    %85 = arith.addf %3, %84 : vector<16x128xf32>
    %c0_33 = arith.constant 0 : index
    %c0_34 = arith.constant 0 : index
    %c0_35 = arith.constant 0 : index
    %86 = vector.load %arg14[%c0_33, %c0_34, %c0_35] : memref<1x1x128xf32, #tpu.memory_space<vmem>>, vector<1x1x128xf32>
    %87 = vector.shape_cast %86 : vector<1x1x128xf32> to vector<1x128xf32>
    %c0_36 = arith.constant 0 : index
    %c0_37 = arith.constant 0 : index
    %c0_38 = arith.constant 0 : index
    %88 = vector.load %arg15[%c0_36, %c0_37, %c0_38] : memref<1x1x128xf32, #tpu.memory_space<vmem>>, vector<1x1x128xf32>
    %89 = vector.shape_cast %88 : vector<1x1x128xf32> to vector<1x128xf32>
    %cst_39 = arith.constant dense<0.000000e+00> : vector<16xf32>
    %90 = vector.multi_reduction <add>, %85, %cst_39 [1] : vector<16x128xf32> to vector<16xf32>
    %91 = vector.shape_cast %90 : vector<16xf32> to vector<16x1xf32>
    %cst_40 = arith.constant 1.280000e+02 : f32
    %92 = vector.broadcast %cst_40 : f32 to vector<16x1xf32>
    %93 = arith.divf %91, %92 : vector<16x1xf32>
    %94 = vector.broadcast %93 : vector<16x1xf32> to vector<16x128xf32>
    %95 = arith.subf %85, %94 : vector<16x128xf32>
    %96 = arith.mulf %95, %95 : vector<16x128xf32>
    %cst_41 = arith.constant dense<0.000000e+00> : vector<16xf32>
    %97 = vector.multi_reduction <add>, %96, %cst_41 [1] : vector<16x128xf32> to vector<16xf32>
    %98 = vector.shape_cast %97 : vector<16xf32> to vector<16x1xf32>
    %cst_42 = arith.constant 1.270000e+02 : f32
    %99 = vector.broadcast %cst_42 : f32 to vector<16x1xf32>
    %100 = arith.divf %98, %99 : vector<16x1xf32>
    %101 = math.sqrt %100 : vector<16x1xf32>
    %cst_43 = arith.constant 9.99999997E-7 : f32
    %102 = vector.broadcast %cst_43 : f32 to vector<16x1xf32>
    %103 = arith.addf %101, %102 : vector<16x1xf32>
    %104 = tpu.reciprocal %103 {approx = true} : vector<16x1xf32> -> vector<16x1xf32>
    %105 = vector.broadcast %93 : vector<16x1xf32> to vector<16x128xf32>
    %106 = arith.subf %85, %105 : vector<16x128xf32>
    %107 = vector.broadcast %87 : vector<1x128xf32> to vector<16x128xf32>
    %108 = arith.mulf %107, %106 : vector<16x128xf32>
    %109 = vector.broadcast %104 : vector<16x1xf32> to vector<16x128xf32>
    %110 = arith.mulf %108, %109 : vector<16x128xf32>
    %111 = vector.broadcast %89 : vector<1x128xf32> to vector<16x128xf32>
    %112 = arith.addf %110, %111 : vector<16x128xf32>
    %113 = arith.truncf %112 : vector<16x128xf32> to vector<16x128xbf16>
    %c0_44 = arith.constant 0 : index
    %c0_45 = arith.constant 0 : index
    %c0_46 = arith.constant 0 : index
    %114 = vector.load %arg10[%c0_44, %c0_45, %c0_46] : memref<1x128x512xbf16, #tpu.memory_space<vmem>>, vector<1x128x512xbf16>
    %115 = vector.shape_cast %114 : vector<1x128x512xbf16> to vector<128x512xbf16>
    %cst_47 = arith.constant dense<0.000000e+00> : vector<16x512xf32>
    %116 = tpu.matmul %113, %115, %cst_47 {dimension_numbers = #tpu.dot_dimension_numbers<[1], [0], [0], [1], [0, 0, 1, 1], [], []>} : vector<16x128xbf16>, vector<128x512xbf16>, vector<16x512xf32> -> vector<16x512xf32>
    %c0_48 = arith.constant 0 : index
    %c0_49 = arith.constant 0 : index
    %c0_50 = arith.constant 0 : index
    %117 = vector.load %arg11[%c0_48, %c0_49, %c0_50] : memref<1x1x512xf32, #tpu.memory_space<vmem>>, vector<1x1x512xf32>
    %118 = vector.shape_cast %117 : vector<1x1x512xf32> to vector<1x512xf32>
    %119 = vector.broadcast %118 : vector<1x512xf32> to vector<16x512xf32>
    %120 = arith.addf %116, %119 : vector<16x512xf32>
    %cst_51 = arith.constant 5.000000e-01 : f32
    %121 = vector.broadcast %cst_51 : f32 to vector<16x512xf32>
    %122 = arith.mulf %121, %120 : vector<16x512xf32>
    %cst_52 = arith.constant 4.471500e-02 : f32
    %123 = vector.broadcast %cst_52 : f32 to vector<16x512xf32>
    %124 = arith.mulf %123, %120 : vector<16x512xf32>
    %125 = arith.mulf %124, %120 : vector<16x512xf32>
    %126 = arith.mulf %125, %120 : vector<16x512xf32>
    %127 = arith.addf %120, %126 : vector<16x512xf32>
    %cst_53 = arith.constant 0.797884583 : f32
    %128 = vector.broadcast %cst_53 : f32 to vector<16x512xf32>
    %129 = arith.mulf %128, %127 : vector<16x512xf32>
    %130 = math.tanh %129 : vector<16x512xf32>
    %cst_54 = arith.constant 1.000000e+00 : f32
    %131 = vector.broadcast %cst_54 : f32 to vector<16x512xf32>
    %132 = arith.addf %131, %130 : vector<16x512xf32>
    %133 = arith.mulf %122, %132 : vector<16x512xf32>
    %134 = arith.truncf %133 : vector<16x512xf32> to vector<16x512xbf16>
    %c0_55 = arith.constant 0 : index
    %c0_56 = arith.constant 0 : index
    %c0_57 = arith.constant 0 : index
    %135 = vector.load %arg12[%c0_55, %c0_56, %c0_57] : memref<1x512x128xbf16, #tpu.memory_space<vmem>>, vector<1x512x128xbf16>
    %136 = vector.shape_cast %135 : vector<1x512x128xbf16> to vector<512x128xbf16>
    %cst_58 = arith.constant dense<0.000000e+00> : vector<16x128xf32>
    %137 = tpu.matmul %134, %136, %cst_58 {dimension_numbers = #tpu.dot_dimension_numbers<[1], [0], [0], [1], [0, 0, 1, 1], [], []>} : vector<16x512xbf16>, vector<512x128xbf16>, vector<16x128xf32> -> vector<16x128xf32>
    %c0_59 = arith.constant 0 : index
    %c0_60 = arith.constant 0 : index
    %c0_61 = arith.constant 0 : index
    %138 = vector.load %arg13[%c0_59, %c0_60, %c0_61] : memref<1x1x128xf32, #tpu.memory_space<vmem>>, vector<1x1x128xf32>
    %139 = vector.shape_cast %138 : vector<1x1x128xf32> to vector<1x128xf32>
    %140 = vector.broadcast %139 : vector<1x128xf32> to vector<16x128xf32>
    %141 = arith.addf %137, %140 : vector<16x128xf32>
    %142 = arith.addf %85, %141 : vector<16x128xf32>
    %c0_62 = arith.constant 0 : index
    %c0_63 = arith.constant 0 : index
    %143 = vector.load %arg16[%c0_62, %c0_63] : memref<16x128xf32, #tpu.memory_space<vmem>>, vector<16x128xf32>
    tpu.vector_store %arg16[%c0_62, %c0_63], %142 {strides = array<i32>} : memref<16x128xf32, #tpu.memory_space<vmem>>, vector<16x128xf32>,
    return
  }
  func.func @transform_0(%arg0: i32, %arg1: i32) -> (i32, i32) {
    %c0_i32 = arith.constant 0 : i32
    %c0_i32_0 = arith.constant 0 : i32
    return %arg0, %c0_i32 : i32, i32
  }
  func.func @transform_1(%arg0: i32, %arg1: i32) -> (i32, i32, i32) {
    %c0_i32 = arith.constant 0 : i32
    %c0_i32_0 = arith.constant 0 : i32
    %c0_i32_1 = arith.constant 0 : i32
    return %arg0, %c0_i32, %c0_i32_0 : i32, i32, i32
  }
  func.func @transform_2(%arg0: i32, %arg1: i32) -> (i32, i32, i32) {
    %c0_i32 = arith.constant 0 : i32
    %c0_i32_0 = arith.constant 0 : i32
    %c0_i32_1 = arith.constant 0 : i32
    return %arg1, %c0_i32, %c0_i32_0 : i32, i32, i32
  }
  func.func @transform_3(%arg0: i32, %arg1: i32) -> (i32, i32, i32) {
    %c0_i32 = arith.constant 0 : i32
    %c0_i32_0 = arith.constant 0 : i32
    %c0_i32_1 = arith.constant 0 : i32
    return %arg1, %c0_i32, %c0_i32_0 : i32, i32, i32
  }
  func.func @transform_4(%arg0: i32, %arg1: i32) -> (i32, i32, i32) {
    %c0_i32 = arith.constant 0 : i32
    %c0_i32_0 = arith.constant 0 : i32
    %c0_i32_1 = arith.constant 0 : i32
    return %arg1, %c0_i32, %c0_i32_0 : i32, i32, i32
  }
  func.func @transform_5(%arg0: i32, %arg1: i32) -> (i32, i32, i32) {
    %c0_i32 = arith.constant 0 : i32
    %c0_i32_0 = arith.constant 0 : i32
    %c0_i32_1 = arith.constant 0 : i32
    return %arg1, %c0_i32, %c0_i32_0 : i32, i32, i32
  }
  func.func @transform_6(%arg0: i32, %arg1: i32) -> (i32, i32, i32) {
    %c0_i32 = arith.constant 0 : i32
    %c0_i32_0 = arith.constant 0 : i32
    %c0_i32_1 = arith.constant 0 : i32
    return %arg1, %c0_i32, %c0_i32_0 : i32, i32, i32
  }
  func.func @transform_7(%arg0: i32, %arg1: i32) -> (i32, i32, i32) {
    %c0_i32 = arith.constant 0 : i32
    %c0_i32_0 = arith.constant 0 : i32
    %c0_i32_1 = arith.constant 0 : i32
    return %arg1, %c0_i32, %c0_i32_0 : i32, i32, i32
  }
  func.func @transform_8(%arg0: i32, %arg1: i32) -> (i32, i32, i32) {
    %c0_i32 = arith.constant 0 : i32
    %c0_i32_0 = arith.constant 0 : i32
    %c0_i32_1 = arith.constant 0 : i32
    return %arg1, %c0_i32, %c0_i32_0 : i32, i32, i32
  }
  func.func @transform_9(%arg0: i32, %arg1: i32) -> (i32, i32, i32) {
    %c0_i32 = arith.constant 0 : i32
    %c0_i32_0 = arith.constant 0 : i32
    %c0_i32_1 = arith.constant 0 : i32
    return %arg1, %c0_i32, %c0_i32_0 : i32, i32, i32
  }
  func.func @transform_10(%arg0: i32, %arg1: i32) -> (i32, i32, i32) {
    %c0_i32 = arith.constant 0 : i32
    %c0_i32_0 = arith.constant 0 : i32
    %c0_i32_1 = arith.constant 0 : i32
    return %arg1, %c0_i32, %c0_i32_0 : i32, i32, i32
  }
  func.func @transform_11(%arg0: i32, %arg1: i32) -> (i32, i32, i32) {
    %c0_i32 = arith.constant 0 : i32
    %c0_i32_0 = arith.constant 0 : i32
    %c0_i32_1 = arith.constant 0 : i32
    return %arg1, %c0_i32, %c0_i32_0 : i32, i32, i32
  }
  func.func @transform_12(%arg0: i32, %arg1: i32) -> (i32, i32, i32) {
    %c0_i32 = arith.constant 0 : i32
    %c0_i32_0 = arith.constant 0 : i32
    %c0_i32_1 = arith.constant 0 : i32
    return %arg1, %c0_i32, %c0_i32_0 : i32, i32, i32
  }
  func.func @transform_13(%arg0: i32, %arg1: i32) -> (i32, i32, i32) {
    %c0_i32 = arith.constant 0 : i32
    %c0_i32_0 = arith.constant 0 : i32
    %c0_i32_1 = arith.constant 0 : i32
    return %arg1, %c0_i32, %c0_i32_0 : i32, i32, i32
  }
  func.func @transform_14(%arg0: i32, %arg1: i32) -> (i32, i32) {
    %c0_i32 = arith.constant 0 : i32
    %c0_i32_0 = arith.constant 0 : i32
    return %arg0, %c0_i32 : i32, i32
  }
}

</mosaic_0001>

<bundles_post_ra>
// kernel: tpu_custom_call.1
= control target key start
LH: loop header
LB: loop body
LE: loop exit
PB: predicated region body
PF: predicated region fallthrough
CT: control target
= control target key end

     0   :  { %s5923_s0 = inlined_call_operand.hbm [shape: f32[16,128], index: 0, kind: input, shape index: {}]   ;;  %s5924_s1 = inlined_call_operand.hbm [shape: f32[2,1,8], index: 1, kind: input, shape index: {}]   ;;  %s5925_s2 = inlined_call_operand.hbm [shape: bf16[2,128,384], index: 2, kind: input, shape index: {}]   ;;  %s5926_s3 = inlined_call_operand.vmem [shape: f32[2,1,384], index: 3, kind: input, shape index: {}]   ;;  %s5927_s4 = inlined_call_operand.hbm [shape: bf16[2,128,128], index: 4, kind: input, shape index: {}]   ;;  %s5928_s5 = inlined_call_operand.vmem [shape: f32[2,1,128], index: 5, kind: input, shape index: {}]   ;;  %s5929_s6 = inlined_call_operand.vmem [shape: f32[2,1,128], index: 6, kind: input, shape index: {}]   ;;  %s5930_s7 = inlined_call_operand.vmem [shape: f32[2,1,128], index: 7, kind: input, shape index: {}]   ;;  %s5931_s8 = inlined_call_operand.hbm [shape: bf16[2,128,512], index: 8, kind: input, shape index: {}]   ;;  %s5932_s9 = inlined_call_operand.vmem [shape: f32[2,1,512], index: 9, kind: input, shape index: {}]   ;;  %s5933_s10 = inlined_call_operand.hbm [shape: bf16[2,512,128], index: 10, kind: input, shape index: {}]   ;;  %s5934_s11 = inlined_call_operand.vmem [shape: f32[2,1,128], index: 11, kind: input, shape index: {}]   ;;  %s5935_s12 = inlined_call_operand.vmem [shape: f32[2,1,128], index: 12, kind: input, shape index: {}]   ;;  %s5936_s13 = inlined_call_operand.vmem [shape: f32[2,1,128], index: 13, kind: input, shape index: {}]   ;;  %s5937_s14 = inlined_call_operand.hbm [shape: f32[16,128], index: 14, kind: output, shape index: {}]  }
   0x1   :  { %5955 = sst [smem:[#allocation19_spill]] %s5923_s0 }
   0x2   :  { %5956 = sst [smem:[#allocation20_spill]] %s5924_s1 }
   0x3   :  { %5957 = sst [smem:[#allocation21_spill]] %s5925_s2 }
   0x4   :  { %5958 = sst [smem:[#allocation22_spill]] %s5926_s3 }
   0x5   :  { %5959 = sst [smem:[#allocation23_spill]] %s5927_s4 }
   0x6   :  { %5960 = sst [smem:[#allocation24_spill]] %s5929_s6 }
   0x7   :  { %5961 = sst [smem:[#allocation25_spill]] %s5930_s7 }
   0x8   :  { %5962 = sst [smem:[#allocation26_spill]] %s5931_s8 }
   0x9   :  { %5963 = sst [smem:[#allocation27_spill]] %s5932_s9 }
   0xa   :  { %5964 = sst [smem:[#allocation28_spill]] %s5933_s10 }
   0xb   :  { %5965 = sst [smem:[#allocation29_spill]] %s5934_s11 }
   0xc   :  { %5966 = sst [smem:[#allocation30_spill]] %s5935_s12 }
   0xd   :  { %5967 = sst [smem:[#allocation31_spill]] %s5936_s13 }
   0xe   :  { %5968 = sst [smem:[#allocation32_spill]] %s5937_s14 }
   0xf   :  { %19 = vsyncpa [#allocation3], 0 }
  0x10   :  { %20 = vsyncpa [#allocation6], 0 }
  0x11   :  { %21 = vsyncpa [#allocation4], 0  ;;  %s5105_s29 = smov 0   ;;  %s5107_s30 = smov 0  }
  0x12   :  { %s5109_s15 = smov 0   ;;  %s5111_s16 = smov 0  }
  0x13   :  { %s5113_s17 = smov 0   ;;  %s5115_s18 = smov 0  }
  0x14 LB: > { %5969 = sst [smem:[#allocation16_spill]] %s5003_s17  ;;  %s5134_s19 = sadd.s32 4294967295, %s5007_s18   ;;  %s5007_s18 = sphi %s5115_s18, %s27_s18   ;;  %s5003_s17 = sphi %s5113_s17, %s6019_s17   ;;  %s4999_s16 = sphi %s5111_s16, %s6018_s16   ;;  %s4995_s15 = sphi %s5109_s15, %s6022_s15   ;;  %s4991_s30 = sphi %s5107_s30, %s6021_s30   ;;  %s4987_s29 = sphi %s5105_s29, %s6020_s29  }
  0x15   : > { %p105_p0 = scmp.ne.s32.totalorder %s4995_s15, %s4991_s30  ;;  %p106_p1 = scmp.eq.s32.totalorder %s5007_s18, 0 }
  0x16   : > { %p111_p2 = scmp.ne.s32.totalorder %s4991_s30, %s4987_s29  ;;  %p5939_p3 = scmp.eq.s32.totalorder %s5134_s19, 0 }
  0x17   : > { %p107_p4 = por %p106_p1, %p105_p0  ;;  %p3705_p5 = scmp.ge.s32.totalorder %s5007_s18, 1 }
  0x18   : > { %p5145_p6 = por %p5939_p3, %p111_p2  ;;  %p434_p7 = scmp.lt.s32.totalorder %s5007_s18, 3 }
  0x19   : > { %s5009_s23 = smov [#allocation2]   ;;  %p4178_p10 = scmp.lt.s32.totalorder %s5007_s18, 2 }
  0x1a   : > { %s5970_s21 = scalar_select %p5145_p6, 1, 0 }
  0x1b   : > { %p5150_p8 = pnand %p3705_p5, %p434_p7  ;;  %s449_s24 = sshll.u32 %s5009_s23, 4  ;;  %s450_s24 = int_to_ptr.vmem [resolvable:$true] %s449_s24 }
  0x1c   : > { %p5163_p12 = pnand %p4178_p10, %p107_p4  ;;  %s36_s27 = sadd.s32 1, %s5003_s17 }
  0x1d   : > { %s5971_s22 = scalar_select %p5150_p8, 1, 0 }
  0x1e   : > { %p4156_p9 = pneg %p5150_p8  ;;  %s5974_s0 = sld [smem:[#allocation19_spill]] }
  0x1f   : > { %s5973_s26 = scalar_select %p5163_p12, 1, 0 }
  0x20   : > { %p5159_p11 = pnand %p4156_p9, %p5939_p3 }
  0x22   : > { %s5972_s25 = scalar_select %p5159_p11, 1, 0 }
  0x23   : > { %p5943_p0 = pneg %p5159_p11 }
  0x24   : > { %s4743_s23 = scalar_lea.hbm %s5974_s0, 256 }
  0x25   : > { %p4744_p13 = scmp.ne.s32.totalorder %s5974_s0, %s4743_s23  ;;  %p4750_p4 = scmp.lt.u32.totalorder %s4743_s23, %s5974_s0 }
  0x27   : > { %p4746_p1 = pnand %p5943_p0, %p4744_p13 }
  0x29   : > { %p4747_p2 = pneg %p4746_p1 }
  0x2b   : > { %p4752_p5 = pnand %p4750_p4, %p4747_p2 }
  0x2d   : > { %4755 = shalt.err (!%p4752_p5)
}
  0x2e   : > { %s4756_s11 = scalar_lea.vmem %s450_s24, 256  ;;  %p4764_p3 = scmp.lt.s32.totalorder %s450_s24, %s450_s24 }
  0x2f   : > { %p4757_p7 = scmp.ne.s32.totalorder %s450_s24, %s4756_s11  ;;  %p4765_p6 = scmp.lt.s32.totalorder %s4756_s11, %s4756_s11 }
  0x31   : > { %p4759_p9 = pnand %p4757_p7, %p5943_p0  ;;  %p4766_p8 = por %p4765_p6, %p4764_p3 }
  0x33   : > { %p4760_p10 = pneg %p4759_p9 }
  0x35   : > { %p4767_p12 = pnand %p4766_p8, %p4760_p10 }
  0x37   : > { %4770 = shalt.err (!%p4767_p12)
}
  0x38   : > { %s5010_s14 = smov 128   ;;  %s5011_s12 = smov 8  }
  0x39   : > { %4159 = dma.hbm_to_vmem [thread:$0]  (!%p5159_p11), %s5974_s0, 256, %s450_s24, [#allocation3], %s5010_s14, %s5010_s14, %s5011_s12  }
  0x3a   : > { %p37_p13 = scmp.ge.s32.totalorder %s36_s27, 2  ;;  %s479_s28 = sand.u32 1, %s5007_s18  }
  0x3b   : > { %s5192_s11 = sand.u32 1, %s4995_s15   ;;  %s4133_s9 = smul.u32 3072, %s5003_s17 }
  0x3c   : > { %s6024_s27 = smov (%p37_p13, %s36_s27), 0  ;;  %s4132_s29 = smul.u32 192, %s5192_s11 }
  0x3d   : > { %5975 = sst [smem:[#allocation17_spill]] %s6024_s27  ;;  %s95_s23 = ssub.s32 %s5003_s17, %s6024_s27 }
  0x3e   : > { %p96_p3 = scmp.eq.s32.totalorder %s95_s23, 0  ;;  %s5976_s2 = sld [smem:[#allocation21_spill]] }
  0x3f   : > { %s483_s24 = scalar_lea.vmem [#allocation7], %s4132_s29  ;;  %s5977_s12 = sadd.s32 1, %s4995_s15 }
  0x40   : > { %s490_s14 = sshll.u32 %s483_s24, 4  ;;  %s5213_s0 = scalar_lea.sflag [#allocation3], %s479_s28  ;;  %s5210_s14 = int_to_ptr.vmem [resolvable:$true] %s490_s14 }
  0x41   : > { %s5208_s13 = scalar_select %p96_p3, %s4995_s15, %s5977_s12  }
  0x42   : > { %p5979_p8 = scmp.ne.s32.totalorder %s5973_s26, 0 }
  0x43   : > { %5978 = sst [smem:[#allocation18_spill]] %s5208_s13 }
  0x44   : > { %s5203_s6 = scalar_lea.hbm %s5976_s2, %s4133_s9  ;;  %p5219_p12 = pneg %p5979_p8 }
  0x45   : > { %s4771_s23 = scalar_lea.hbm %s5203_s6, 3072  ;;  %s4776_s29 = scalar_lea.hbm %s5976_s2, 6144 }
  0x46   : > { %p4772_p6 = scmp.ne.s32.totalorder %s5203_s6, %s4771_s23  ;;  %p4777_p4 = scmp.lt.u32.totalorder %s5203_s6, %s5976_s2 }
  0x47   : > { %s5980_s3 = scalar_select %p5219_p12, 1, 0 }
  0x48   : > { %p4774_p1 = pnand %p5219_p12, %p4772_p6  ;;  %p4778_p5 = scmp.lt.u32.totalorder %s4776_s29, %s4771_s23 }
  0x49   : > { %p4780_p9 = scmp.lt.u32.totalorder %s4771_s23, %s5203_s6 }
  0x4a   : > { %p4775_p2 = pneg %p4774_p1  ;;  %p4779_p7 = por %p4778_p5, %p4777_p4 }
  0x4c   : > { %p4781_p10 = por %p4780_p9, %p4779_p7 }
  0x4e   : > { %p4782_p13 = pnand %p4781_p10, %p4775_p2 }
  0x50   : > { %4785 = shalt.err (!%p4782_p13)
}
  0x51   : > { %s4786_s28 = scalar_lea.vmem %s5210_s14, 3072  ;;  %s5012_s7 = smov [#allocation7]  }
  0x52   : > { %p4787_p3 = scmp.ne.s32.totalorder %s5210_s14, %s4786_s28  ;;  %s4791_s9 = sshll.u32 %s5012_s7, 4  ;;  %s4792_s9 = int_to_ptr.vmem [resolvable:$false] %s4791_s9 }
  0x53   : > { %s4793_s24 = scalar_lea.vmem %s4792_s9, 6144  ;;  %p4794_p0 = scmp.lt.s32.totalorder %s5210_s14, %s4792_s9 }
  0x54   : > { %p4789_p6 = pnand %p4787_p3, %p5219_p12  ;;  %p4795_p11 = scmp.lt.s32.totalorder %s4793_s24, %s4786_s28 }
  0x56   : > { %p4790_p1 = pneg %p4789_p6  ;;  %p4796_p4 = por %p4795_p11, %p4794_p0 }
  0x58   : > { %p4797_p5 = pnand %p4796_p4, %p4790_p1 }
  0x5a   : > { %4800 = shalt.err (!%p4797_p5)
}
  0x5b   : > { %s5013_s23 = smov 192   ;;  %s5014_s29 = smov 12  }
  0x5c   : > { %4166 = dma.hbm_to_vmem [thread:$0]  (!%p5979_p8), %s5203_s6, 3072, %s5210_s14, %s5213_s0, %s5013_s23, %s5013_s23, %s5014_s29  }
  0x5d   : > { %s3859_s12 = sshll.u32 %s5003_s17, 10  ;;  %s5981_s4 = sld [smem:[#allocation23_spill]] }
  0x5e   : > { %s5982_s28 = sshll.u32 %s5192_s11, 6 }
  0x5f   : > { %s511_s24 = scalar_lea.vmem [#allocation8], %s5982_s28 }
  0x60   : > { %s518_s2 = sshll.u32 %s511_s24, 4  ;;  %s5251_s2 = int_to_ptr.vmem [resolvable:$true] %s518_s2 }
  0x63   : > { %s5247_s9 = scalar_lea.hbm %s5981_s4, %s3859_s12  ;;  %s4806_s20 = scalar_lea.hbm %s5981_s4, 2048 }
  0x64   : > { %s4801_s27 = scalar_lea.hbm %s5247_s9, 1024  ;;  %p4807_p7 = scmp.lt.u32.totalorder %s5247_s9, %s5981_s4 }
  0x65   : > { %p4802_p11 = scmp.ne.s32.totalorder %s5247_s9, %s4801_s27  ;;  %p4808_p9 = scmp.lt.u32.totalorder %s4806_s20, %s4801_s27 }
  0x66   : > { %p4810_p13 = scmp.lt.u32.totalorder %s4801_s27, %s5247_s9 }
  0x67   : > { %p4804_p0 = pnand %p4802_p11, %p5219_p12  ;;  %p4809_p10 = por %p4808_p9, %p4807_p7 }
  0x69   : > { %p4805_p2 = pneg %p4804_p0  ;;  %p4811_p3 = por %p4810_p13, %p4809_p10 }
  0x6b   : > { %p4812_p6 = pnand %p4811_p3, %p4805_p2 }
  0x6d   : > { %4815 = shalt.err (!%p4812_p6)
}
  0x6e   : > { %s4816_s12 = scalar_lea.vmem %s5251_s2, 1024  ;;  %s5015_s7 = smov [#allocation8]  }
  0x6f   : > { %p4817_p1 = scmp.ne.s32.totalorder %s5251_s2, %s4816_s12  ;;  %s4821_s28 = sshll.u32 %s5015_s7, 4  ;;  %s4822_s28 = int_to_ptr.vmem [resolvable:$false] %s4821_s28 }
  0x70   : > { %s4823_s24 = scalar_lea.vmem %s4822_s28, 2048  ;;  %p4824_p11 = scmp.lt.s32.totalorder %s5251_s2, %s4822_s28 }
  0x71   : > { %p4819_p4 = pnand %p4817_p1, %p5219_p12  ;;  %p4825_p0 = scmp.lt.s32.totalorder %s4823_s24, %s4816_s12 }
  0x73   : > { %p4820_p5 = pneg %p4819_p4  ;;  %p4826_p7 = por %p4825_p0, %p4824_p11 }
  0x75   : > { %p4827_p9 = pnand %p4826_p7, %p4820_p5 }
  0x77   : > { %4830 = shalt.err (!%p4827_p9)
}
  0x78   : > { %s5947_s27 = smov 64   ;;  %s5948_s6 = smov 4  }
  0x79   : > { %4169 = dma.hbm_to_vmem [thread:$0]  (!%p5979_p8), %s5247_s9, 1024, %s5251_s2, %s5213_s0, %s5947_s27, %s5947_s27, %s5948_s6  }
  0x7a   : > { %s5949_s14 = sshll.u32 %s5192_s11, 8  ;;  %s5950_s20 = sshll.u32 %s5003_s17, 12 }
  0x7b   : > { %s5983_s8 = sld [smem:[#allocation26_spill]]  ;;  %s550_s7 = scalar_lea.vmem [#allocation9], %s5949_s14 }
  0x7c   : > { %s557_s28 = sshll.u32 %s550_s7, 4  ;;  %s5289_s28 = int_to_ptr.vmem [resolvable:$true] %s557_s28 }
  0x81   : > { %s5285_s12 = scalar_lea.hbm %s5983_s8, %s5950_s20  ;;  %s4836_s23 = scalar_lea.hbm %s5983_s8, 8192 }
  0x82   : > { %s4831_s24 = scalar_lea.hbm %s5285_s12, 4096  ;;  %p4837_p3 = scmp.lt.u32.totalorder %s5285_s12, %s5983_s8 }
  0x83   : > { %p4832_p2 = scmp.ne.s32.totalorder %s5285_s12, %s4831_s24  ;;  %p4838_p6 = scmp.lt.u32.totalorder %s4836_s23, %s4831_s24 }
  0x84   : > { %p4840_p4 = scmp.lt.u32.totalorder %s4831_s24, %s5285_s12 }
  0x85   : > { %p4834_p10 = pnand %p4832_p2, %p5219_p12  ;;  %p4839_p1 = por %p4838_p6, %p4837_p3 }
  0x87   : > { %p4835_p13 = pneg %p4834_p10  ;;  %p4841_p5 = por %p4840_p4, %p4839_p1 }
  0x89   : > { %p4842_p11 = pnand %p4841_p5, %p4835_p13 }
  0x8b   : > { %4845 = shalt.err (!%p4842_p11)
}
  0x8c   : > { %s4846_s7 = scalar_lea.vmem %s5289_s28, 4096  ;;  %s5018_s2 = smov [#allocation9]  }
  0x8d   : > { %p4847_p0 = scmp.ne.s32.totalorder %s5289_s28, %s4846_s7  ;;  %s4851_s9 = sshll.u32 %s5018_s2, 4  ;;  %s4852_s9 = int_to_ptr.vmem [resolvable:$false] %s4851_s9 }
  0x8e   : > { %s4853_s27 = scalar_lea.vmem %s4852_s9, 8192  ;;  %p4854_p2 = scmp.lt.s32.totalorder %s5289_s28, %s4852_s9 }
  0x8f   : > { %p4849_p7 = pnand %p4847_p0, %p5219_p12  ;;  %p4855_p10 = scmp.lt.s32.totalorder %s4853_s27, %s4846_s7 }
  0x91   : > { %p4850_p9 = pneg %p4849_p7  ;;  %p4856_p3 = por %p4855_p10, %p4854_p2 }
  0x93   : > { %p4857_p6 = pnand %p4856_p3, %p4850_p9 }
  0x95   : > { %4860 = shalt.err (!%p4857_p6)
}
  0x96   : > { %s5019_s24 = smov 256   ;;  %s5020_s23 = smov 16  }
  0x97   : > { %4172 = dma.hbm_to_vmem [thread:$0]  (!%p5979_p8), %s5285_s12, 4096, %s5289_s28, %s5213_s0, %s5019_s24, %s5019_s24, %s5020_s23  }
  0x98   : > { %s5021_s29 = smov [#allocation5]   ;;  %s5984_s1 = sld [smem:[#allocation20_spill]] }
  0x99   : > { %s465_s6 = sshll.u32 %s5021_s29, 4  ;;  %p5985_p1 = scmp.ne.s32.totalorder %s5972_s25, 0  ;;  %s466_s6 = int_to_ptr.vmem [resolvable:$true] %s465_s6 }
  0x9b   : > { %p5986_p4 = pneg %p5985_p1 }
  0x9e   : > { %s4861_s9 = scalar_lea.hbm %s5984_s1, 32 }
  0x9f   : > { %p4862_p13 = scmp.ne.s32.totalorder %s5984_s1, %s4861_s9  ;;  %p4868_p0 = scmp.lt.u32.totalorder %s4861_s9, %s5984_s1 }
  0xa1   : > { %p4864_p5 = pnand %p4862_p13, %p5986_p4 }
  0xa3   : > { %p4865_p11 = pneg %p4864_p5 }
  0xa5   : > { %p4870_p7 = pnand %p4868_p0, %p4865_p11 }
  0xa7   : > { %4873 = shalt.err (!%p4870_p7)
}
  0xa8   : > { %s4874_s12 = scalar_lea.vmem %s466_s6, 32  ;;  %p5987_p2 = pmov %p5986_p4 }
  0xa9   : > { %p4875_p9 = scmp.ne.s32.totalorder %s466_s6, %s4874_s12  ;;  %p4882_p6 = scmp.lt.s32.totalorder %s466_s6, %s466_s6 }
  0xaa   : > { %p4883_p8 = scmp.lt.s32.totalorder %s4874_s12, %s4874_s12 }
  0xab   : > { %p4877_p10 = pnand %p4875_p9, %p5987_p2 }
  0xac   : > { %p4884_p12 = por %p4883_p8, %p4882_p6 }
  0xad   : > { %p4878_p3 = pneg %p4877_p10 }
  0xaf   : > { %p4885_p4 = pnand %p4884_p12, %p4878_p3 }
  0xb1   : > { %4888 = shalt.err (!%p4885_p4)
}
  0xb2   : > { %s5022_s14 = smov 1   ;;  %s5988_s20 = sshll.u32 %s5003_s17, 12 }
  0xb3   : > { %4162 = dma.hbm_to_vmem [thread:$0]  (!%p5985_p1), %s5984_s1, 32, %s466_s6, [#allocation6], %s5020_s23, %s5020_s23, %s5022_s14  }
  0xb4   : > { %s5989_s10 = sld [smem:[#allocation28_spill]]  ;;  %s5990_s9 = sshll.u32 %s5192_s11, 8 }
  0xb5   : > { %s578_s7 = scalar_lea.vmem [#allocation10], %s5990_s9  ;;  %p5991_p12 = scmp.ne.s32.totalorder %s5980_s3, 0 }
  0xb6   : > { %s585_s25 = sshll.u32 %s578_s7, 4  ;;  %s5342_s25 = int_to_ptr.vmem [resolvable:$true] %s585_s25 }
  0xba   : > { %s5338_s2 = scalar_lea.hbm %s5989_s10, %s5988_s20  ;;  %s4894_s12 = scalar_lea.hbm %s5989_s10, 8192 }
  0xbb   : > { %s4889_s27 = scalar_lea.hbm %s5338_s2, 4096  ;;  %p4895_p5 = scmp.lt.u32.totalorder %s5338_s2, %s5989_s10 }
  0xbc   : > { %p4890_p8 = scmp.ne.s32.totalorder %s5338_s2, %s4889_s27  ;;  %p4896_p11 = scmp.lt.u32.totalorder %s4894_s12, %s4889_s27 }
  0xbd   : > { %p4898_p7 = scmp.lt.u32.totalorder %s4889_s27, %s5338_s2 }
  0xbe   : > { %p4892_p13 = pnand %p4890_p8, %p5991_p12  ;;  %p4897_p0 = por %p4896_p11, %p4895_p5 }
  0xc0   : > { %p4893_p1 = pneg %p4892_p13  ;;  %p4899_p9 = por %p4898_p7, %p4897_p0 }
  0xc2   : > { %p4900_p2 = pnand %p4899_p9, %p4893_p1 }
  0xc4   : > { %4903 = shalt.err (!%p4900_p2)
}
  0xc5   : > { %s4904_s11 = scalar_lea.vmem %s5342_s25, 4096  ;;  %s5023_s4 = smov [#allocation10]  }
  0xc6   : > { %p4905_p10 = scmp.ne.s32.totalorder %s5342_s25, %s4904_s11  ;;  %s4909_s20 = sshll.u32 %s5023_s4, 4  ;;  %s4910_s20 = int_to_ptr.vmem [resolvable:$false] %s4909_s20 }
  0xc7   : > { %s4911_s24 = scalar_lea.vmem %s4910_s20, 8192  ;;  %p4912_p4 = scmp.lt.s32.totalorder %s5342_s25, %s4910_s20 }
  0xc8   : > { %p4907_p3 = pnand %p4905_p10, %p5991_p12  ;;  %p4913_p8 = scmp.lt.s32.totalorder %s4911_s24, %s4904_s11 }
  0xca   : > { %p4908_p6 = pneg %p4907_p3  ;;  %p4914_p13 = por %p4913_p8, %p4912_p4 }
  0xcc   : > { %p4915_p5 = pnand %p4914_p13, %p4908_p6 }
  0xce   : > { %4918 = shalt.err (!%p4915_p5)
}
  0xcf   : > { %p5992_p1 = scmp.ne.s32.totalorder %s5973_s26, 0  ;;  %s5993_s29 = smov 4  }
  0xd0   : > { %s5994_s9 = smov 64   ;;  %p5995_p12 = scmp.ne.s32.totalorder %s5971_s22, 0 }
  0xd1   : > { %4175 = dma.hbm_to_vmem [thread:$0]  (!%p5992_p1), %s5338_s2, 4096, %s5342_s25, %s5213_s0, %s5994_s9, %s5994_s9, %s5993_s29  }
  0xd2   : > { %615 = sbr.rel (%p5995_p12) target bundleno = 3101 (0xc1d), region = 76  ;;  %p5996_p11 = scmp.eq.s32.totalorder (!%p5995_p12), %s5134_s19, 0 }
  0xd9   : > { %4970 = dma.done.wait (%p5996_p11), [#allocation3], 256   ;;  %p5997_p0 = pmov %p5996_p11 }
  0xdb   : > { %4972 = vsyncadd (%p5997_p0), [#allocation3], 4294967040  ;;  %p5998_p7 = pmov %p5997_p0 }
  0xdc   : > { %p5999_p9 = pmov %p5997_p0 }
  0xdd   : > { %4974 = dma.done.wait (%p5998_p7), [#allocation6], 32  }
  0xde   : > { %4976 = vsyncadd (%p5999_p9), [#allocation6], 4294967264  ;;  %s625_s26 = sand.u32 1, %s5134_s19   ;;  %s627_s0 = sand.u32 1, %s4991_s30  }
  0xdf   : > { %s4134_s3 = smul.u32 192, %s627_s0  ;;  %s626_s22 = scalar_lea.sflag [#allocation3], %s625_s26 }
  0xe0   : > { %p6000_p2 = scmp.ne.s32.totalorder %s5970_s21, 0 }
  0xe1   : > { %s5381_s2 = scalar_lea.vmem [#allocation7], %s4134_s3 }
  0xe2   : > { %4978 = dma.done.wait (%p6000_p2), %s626_s22, 12288  }
  0xe3   : > { %4980 = vsyncadd (%p6000_p2), %s626_s22, 4294955008  ;;  %s3722_s7 = sshll.u32 %s627_s0, 6  ;;  %s3723_s25 = sshll.u32 %s627_s0, 8 }
  0xe4   : > { %p739_p10 = scmp.lt.s32.totalorder %s4999_s16, 1  ;;  %s6003_s3 = sld [smem:[#allocation22_spill]] }
  0xe5   : > { %s6004_s17 = sld [smem:[#allocation27_spill]]  ;;  %s6005_s21 = sld [smem:[#allocation29_spill]] }
  0xe6   : > { %s5389_s27 = scalar_select %p739_p10, %s4999_s16, 1 }
  0xe7   : > { %s6006_s4 = sld [smem:[#allocation30_spill]]  ;;  %s6007_s9 = sld [smem:[#allocation31_spill]] }
  0xe8   : > { %s4135_s6 = smul.u32 3, %s5389_s27  ;;  %s3725_s1 = sshll.u32 %s5389_s27, 2 }
  0xe9   : > { %s5429_s0 = scalar_lea.vmem [#allocation9], %s3723_s25  ;;  %p3726_p3 = scmp.ne.s32.totalorder %s4999_s16, 0 }
  0xea   : > { %s5407_s22 = scalar_lea.vmem %s6003_s3, %s4135_s6  ;;  %s5427_s6 = scalar_lea.vmem [#allocation8], %s3722_s7  ;;  %v771_v0 = vld [vmem:[#allocation2] sm:$0xff] (!%p3726_p3)  ;;  %v772_v1 = vld [vmem:[#allocation2 + $0x8] sm:$0xff] (!%p3726_p3) }
  0xeb   : > { %s5413_s13 = scalar_lea.vmem %s6004_s17, %s3725_s1  ;;  %s758_s14 = scalar_lea.vmem %s6005_s21, %s5389_s27  ;;  %773 = vst [vmem:[#allocation11] sm:$0xff] (!%p3726_p3), %v771_v0  ;;  %774 = vst [vmem:[#allocation11 + $0x8] sm:$0xff] (!%p3726_p3), %v772_v1 }
  0xec   : > { %s5431_s3 = scalar_lea.vmem [#allocation10], %s3723_s25  ;;  %770 = sbr.rel (%p3726_p3) target bundleno = 243 (0xf3), region = 104 }
  0xed   : > { %s761_s20 = scalar_lea.vmem %s6006_s4, %s5389_s27  ;;  %s764_s26 = scalar_lea.vmem %s6007_s9, %s5389_s27 }
  0xf3 PF: > { %v775_v2 = vld [vmem:[#allocation11] sm:$0xff]  ;;  %v776_v3 = vld [vmem:[#allocation11 + $0x8] sm:$0xff]  ;;  %v5024_v15 = vmov 0.0   ;;  %v4567_v20 = vld [vmem:[%s5381_s2 + $0x30] ss:$12 sps:$4 sm:$0xff]   ;;  %v5025_v29 = vmov 0   ;;  %v870_v1 = vlaneseq  ;;  %s6012_s9 = scalar_lea.vmem %s5928_s5, %s5389_s27 }
  0xf4   : > { %781 = vadd.xlane.f32.xlu0 %v775_v2  ;;  %v4557_v12 = vld [vmem:[%s5381_s2 + $0x4] ss:$12 sps:$4 sm:$0xff]   ;;  %v4559_v13 = vld [vmem:[%s5381_s2] ss:$12 sps:$4 sm:$0xff]   ;;  %v4560_v14 = vld [vmem:[%s5381_s2 + $0x8] ss:$12 sps:$4 sm:$0xff]   ;;  %3972 = vmatprep.subr.bf16.mxu1 %v5024_v15 }
  0xf5   : > { %1013 = vmatprep.subr.bf16.mxu0 %v4557_v12  ;;  %3973 = vmatpush3.bf16.msra.mxu1 %v4560_v14  ;;  %v4561_v16 = vld [vmem:[%s5381_s2 + $0x1c] ss:$12 sps:$4 sm:$0xff]   ;;  %v4563_v17 = vld [vmem:[%s5381_s2 + $0x18] ss:$12 sps:$4 sm:$0xff]   ;;  %v4564_v18 = vld [vmem:[%s5381_s2 + $0x20] ss:$12 sps:$4 sm:$0xff]  }
  0xf6   : > { %1014 = vmatpush1.bf16.msra.mxu0 %v4559_v13  ;;  %3974 = vmatprep.subr.bf16.mxu1 %v5024_v15  ;;  %v4565_v19 = vld [vmem:[%s5381_s2 + $0x34] ss:$12 sps:$4 sm:$0xff]   ;;  %v4568_v21 = vld [vmem:[%s5381_s2 + $0x38] ss:$12 sps:$4 sm:$0xff]   ;;  %v4572_v24 = vld [vmem:[%s5381_s2 + $0x50] ss:$12 sps:$4 sm:$0xff]  }
  0xf7   : > { %1015 = vmatprep.subr.bf16.mxu0 %v4561_v16  ;;  %v4569_v22 = vld [vmem:[%s5381_s2 + $0x4c] ss:$12 sps:$4 sm:$0xff]   ;;  %v4571_v23 = vld [vmem:[%s5381_s2 + $0x48] ss:$12 sps:$4 sm:$0xff]   ;;  %v4573_v25 = vld [vmem:[%s5381_s2 + $0x64] ss:$12 sps:$4 sm:$0xff]   ;;  %1045 = vmatprep.mubr.bf16.mxu0 %v5025_v29 }
  0xf8   : > { %783 = vadd.xlane.f32.xlu0 %v776_v3  ;;  %v4575_v26 = vld [vmem:[%s5381_s2 + $0x60] ss:$12 sps:$4 sm:$0xff]   ;;  %v4576_v27 = vld [vmem:[%s5381_s2 + $0x68] ss:$12 sps:$4 sm:$0xff]   ;;  %vm5026_vm0 = vmmov 0   ;;  %s6008_s10 = sld [smem:[#allocation24_spill]] }
  0xf9   : > { %3975 = vmatpush3.bf16.msra.mxu1 %v4564_v18  ;;  %v4577_v28 = vld [vmem:[%s5381_s2 + $0x7c] ss:$12 sps:$4 sm:$0xff]   ;;  %3988 = vmatprep.mubr.msk.bf16.mxu1 %vm5026_vm0, %v5024_v15  ;;  %v4579_v30 = vld [vmem:[%s5381_s2 + $0x78] ss:$12 sps:$4 sm:$0xff]   ;;  %v4580_v31 = vld [vmem:[%s5381_s2 + $0x80] ss:$12 sps:$4 sm:$0xff]  }
  0xfa   : > { %1016 = vmatpush1.bf16.msra.mxu0 %v4563_v17  ;;  %3976 = vmatprep.subr.bf16.mxu1 %v5024_v15  ;;  %v4581_v32 = vld [vmem:[%s5381_s2 + $0x94] ss:$12 sps:$4 sm:$0xff]   ;;  %v4583_v33 = vld [vmem:[%s5381_s2 + $0x90] ss:$12 sps:$4 sm:$0xff]   ;;  %v4584_v34 = vld [vmem:[%s5381_s2 + $0x98] ss:$12 sps:$4 sm:$0xff]  }
  0xfb   : > { %1017 = vmatprep.subr.bf16.mxu0 %v4565_v19  ;;  %v4585_v35 = vld [vmem:[%s5381_s2 + $0xac] ss:$12 sps:$4 sm:$0xff]   ;;  %v4587_v36 = vld [vmem:[%s5381_s2 + $0xa8] ss:$12 sps:$4 sm:$0xff]   ;;  %v4588_v37 = vld [vmem:[%s5381_s2 + $0xb0] ss:$12 sps:$4 sm:$0xff]  }
  0xfc   : > { %s6010_s7 = sld [smem:[#allocation25_spill]]  ;;  %vm1569_vm5 = vcmask 261120   ;;  %vm1934_vm6 = vcmask 64512   ;;  %p4181_p6 = scmp.eq.s32.totalorder %s5134_s19, 1 }
  0xfd   : > { %3977 = vmatpush3.bf16.msra.mxu1 %v4568_v21 }
  0xfe   : > { %1018 = vmatpush1.bf16.msra.mxu0 %v4567_v20  ;;  %3978 = vmatprep.subr.bf16.mxu1 %v5024_v15  ;;  %s6009_s16 = scalar_lea.vmem %s6008_s10, %s5389_s27 }
  0xff   : > { %1019 = vmatprep.subr.bf16.mxu0 %v4569_v22  ;;  %v3727_v54 = vld [vmem:[%s6009_s16] ss:$0 sm:$0xff] }
 0x101   : > { %3979 = vmatpush3.bf16.msra.mxu1 %v4572_v24 }
 0x102   : > { %1020 = vmatpush1.bf16.msra.mxu0 %v4571_v23  ;;  %3980 = vmatprep.subr.bf16.mxu1 %v5024_v15  ;;  %s6011_s25 = scalar_lea.vmem %s6010_s7, %s5389_s27 }
 0x103   : > { %1021 = vmatprep.subr.bf16.mxu0 %v4573_v25  ;;  %v3728_v60 = vld [vmem:[%s6011_s25] ss:$0 sm:$0xff] }
 0x105   : > { %3981 = vmatpush3.bf16.msra.mxu1 %v4576_v27 }
 0x106   : > { %1022 = vmatpush1.bf16.msra.mxu0 %v4575_v26  ;;  %3982 = vmatprep.subr.bf16.mxu1 %v5024_v15 }
 0x107   : > { %1023 = vmatprep.subr.bf16.mxu0 %v4577_v28 }
 0x109   : > { %3983 = vmatpush3.bf16.msra.mxu1 %v4580_v31 }
 0x10a   : > { %1024 = vmatpush1.bf16.msra.mxu0 %v4579_v30  ;;  %3984 = vmatprep.subr.bf16.mxu1 %v5024_v15 }
 0x10b   : > { %1025 = vmatprep.subr.bf16.mxu0 %v4581_v32 }
 0x10d   : > { %3985 = vmatpush3.bf16.msra.mxu1 %v4584_v34 }
 0x10e   : > { %1026 = vmatpush1.bf16.msra.mxu0 %v4583_v33  ;;  %3986 = vmatprep.subr.bf16.mxu1 %v5024_v15 }
 0x10f   : > { %1027 = vmatprep.subr.bf16.mxu0 %v4585_v35 }
 0x111   : > { %3987 = vmatpush3.bf16.msra.mxu1 %v4588_v37 }
 0x112   : > { %1028 = vmatpush1.bf16.msra.mxu0 %v4587_v36  ;;  %3992 = vmatprep.subr.bf16.mxu1 %v5024_v15 }
 0x113   : > { %4024 = vmatprep.subr.bf16.mxu0 %v5024_v15 }
 0x181   : > { %v782_v4 = vpop.xlane.xlu0 %781 }
 0x182   : > { %v786_v5 = vmul.f32 0.0078125, %v782_v4 }
 0x184   : > { %v5434_v6 = vsub.f32 %v775_v2, %v786_v5  ;;  %v5495_v2 = vshrl.u32 %v870_v1, 7  ;;  %v868_v5 = vld [vmem:[%s5407_s22] sm:$0x7] }
 0x185   : > { %v784_v7 = vpop.xlane.xlu0 %783 }
 0x186   : > { %v787_v8 = vmul.f32 0.0078125, %v784_v7  ;;  %v790_v9 = vmul.f32 %v5434_v6, %v5434_v6  ;;  %v823_v56 = vmul.f32 %v3727_v54, %v5434_v6  ;;  %v880_v4 = vsub.s32 2, %v5495_v2 }
 0x187   : > { %v876_v6 = vsub.s32 1, %v5495_v2 }
 0x188   : > { %v5438_v10 = vsub.f32 %v776_v3, %v787_v8  ;;  %792 = vadd.xlane.f32.xlu1 %v790_v9  ;;  %v872_v3 = vsub.s32 0, %v5495_v2  ;;  %v881_v8 = vrot.slane %v868_v5, %v880_v4 }
 0x18a   : > { %v791_v11 = vmul.f32 %v5438_v10, %v5438_v10  ;;  %v824_v57 = vmul.f32 %v3727_v54, %v5438_v10  ;;  %v873_v7 = vrot.slane %v868_v5, %v872_v3 }
 0x18c   : > { %794 = vadd.xlane.f32.xlu1 %v791_v11  ;;  %v877_v11 = vrot.slane %v868_v5, %v876_v6 }
 0x215   : > { %v793_v38 = vpop.xlane.xlu1 %792 }
 0x216   : > { %v797_v39 = vmul.f32 0.007874016, %v793_v38 }
 0x218   : > { %4677 = vrsqrt.f32 %v797_v39  ;;  %vm801_vm1 = vcmp.eq.f32.partialorder %v797_v39, inf  ;;  %v804_v44 = vand.u32 2147483648, %v797_v39  ;;  %vm803_vm2 = vcmp.eq.f32.partialorder %v797_v39, 0.0 }
 0x219   : > { %v795_v40 = vpop.xlane.xlu1 %794 }
 0x21a   : > { %v798_v41 = vmul.f32 0.007874016, %v795_v40 }
 0x21c   : > { %4679 = vrsqrt.f32 %v798_v41  ;;  %vm808_vm3 = vcmp.eq.f32.partialorder %v798_v41, inf  ;;  %v811_v50 = vand.u32 2147483648, %v798_v41  ;;  %vm810_vm4 = vcmp.eq.f32.partialorder %v798_v41, 0.0 }
 0x222   : > { %v4678_v42 = vpop.eup %4677 }
 0x223   : > { %v800_v43 = vmul.f32 %v4678_v42, %v797_v39 }
 0x225   : > { %v802_v45 = vsel %vm801_vm1, %v797_v39, %v800_v43 }
 0x226   : > { %v4680_v46 = vpop.eup %4679  ;;  %v805_v47 = vsel %vm803_vm2, %v804_v44, %v802_v45 }
 0x227   : > { %v807_v48 = vmul.f32 %v4680_v46, %v798_v41  ;;  %v813_v49 = vadd.f32 1e-06, %v805_v47 }
 0x229   : > { %v809_v51 = vsel %vm808_vm3, %v798_v41, %v807_v48  ;;  %4681 = vrcp.f32 %v813_v49 }
 0x22a   : > { %v812_v52 = vsel %vm810_vm4, %v811_v50, %v809_v51 }
 0x22b   : > { %v814_v53 = vadd.f32 1e-06, %v812_v52 }
 0x22d   : > { %4683 = vrcp.f32 %v814_v53 }
 0x233   : > { %v4682_v55 = vpop.eup %4681 }
 0x234   : > { %v825_v58 = vmul.f32 %v4682_v55, %v823_v56 }
 0x236   : > { %v833_v62 = vadd.f32 %v3728_v60, %v825_v58 }
 0x237   : > { %v4684_v59 = vpop.eup %4683 }
 0x238   : > { %v826_v61 = vmul.f32 %v4684_v59, %v824_v57 }
 0x23a   : > { %v834_v63 = vadd.f32 %v3728_v60, %v826_v61 }
 0x23c   : > { %v835_v0 = vpack.c.bf16 %v834_v63, %v833_v62 }
 0x23e   : > { %1046 = vmatmul.mubr.bf16.vlgmr.msra.gmra.mrb[0].mxu0 %v835_v0  ;;  %3989 = vmatmul.mubr.bf16.vlgmr.msra.gmra.mrb[0].mxu1 %v835_v0 }
 0x23f   : > { %3996 = vmatprep.mubr.msk.bf16.mxu1 %vm5026_vm0, %v5024_v15  ;;  %4028 = vmatprep.mubr.msk.bf16.mxu0 %vm5026_vm0, %v5024_v15 }
 0x311   : > { %v1047_v9 = vpop.f32.mrb[0].mxu0  ;;  %v1090_v10 = vpop.f32.mrb[0].mxu1 }
 0x312   : > { %v1049_v12 = vpop.f32.mrb[1].mxu0  ;;  %v3990_v13 = vpop.f32.mrb[1].mxu1  ;;  %v1048_v17 = vadd.f32 %v1047_v9, %v873_v7  ;;  %v5507_v18 = vadd.f32 %v1090_v10, %v881_v8 }
 0x313   : > { %v1051_v14 = vpop.f32.mrb[2].mxu0  ;;  %v1093_v16 = vpop.f32.mrb[2].mxu1  ;;  %v1050_v23 = vadd.f32 %v1049_v12, %v877_v11 }
 0x314   : > { %v1052_v19 = vadd.f32 %v1051_v14, %v873_v7  ;;  %v5509_v20 = vadd.f32 %v1093_v16, %v881_v8  ;;  %v1053_v21 = vpop.f32.mrb[3].mxu0  ;;  %v3991_v22 = vpop.f32.mrb[3].mxu1 }
 0x315   : > { %v1054_v24 = vadd.f32 %v1053_v21, %v877_v11 }
 0x316   : > { %v4438_v25 = vpack.i.bf16 %v5509_v20, %v5507_v18  ;;  %v4248_v26 = vpack.i.bf16 %v1052_v19, %v1048_v17 }
 0x317   : > { %v4330_v27 = vpack.i.bf16 %v1054_v24, %v1050_v23 }
 0x318   : > { %4249 = vxpose.xlu0.b32.start.end [1/1] (short) %v4248_v26, 128 }
 0x319   : > { %4331 = vxpose.xlu1.b32.start.end [1/1] (short) %v4330_v27, 128 }
 0x398   : > { %v5513_v28 = vpop.trf.xlu0 }
 0x399   : > { %v4332_v30 = vpop.trf.xlu1  ;;  %v4251_v51 = vunpack.i.l.bf16 %v5513_v28  ;;  %v4254_v27 = vunpack.i.h.bf16 %v5513_v28 }
 0x39a   : > { %v4336_v32 = vunpack.i.h.bf16 %v4332_v30  ;;  %v4333_v33 = vunpack.i.l.bf16 %v4332_v30 }
 0x39c   : > { %v5515_v31 = vpop.trf.xlu0 }
 0x39d   : > { %v4337_v34 = vpop.trf.xlu1  ;;  %v4256_v57 = vunpack.i.l.bf16 %v5515_v31 }
 0x39e   : > { %v4341_v35 = vunpack.i.h.bf16 %v4337_v34  ;;  %v4338_v36 = vunpack.i.l.bf16 %v4337_v34 }
 0x3a0   : > { %v5517_v37 = vpop.trf.xlu0  ;;  %v1553_v38 = vpack.c.bf16 %v4338_v36, %v4333_v33  ;;  %v1561_v39 = vpack.c.bf16 %v4341_v35, %v4336_v32 }
 0x3a1   : > { %v4342_v40 = vpop.trf.xlu1  ;;  %v4261_v5 = vunpack.i.l.bf16 %v5517_v37 }
 0x3a2   : > { %3993 = vmatpush3.bf16.msra.mxu1 %v1553_v38  ;;  %4025 = vmatpush3.bf16.msra.mxu0 %v1561_v39  ;;  %v4346_v42 = vunpack.i.h.bf16 %v4342_v40  ;;  %v4343_v43 = vunpack.i.l.bf16 %v4342_v40  ;;  %v4259_v38 = vunpack.i.h.bf16 %v5515_v31 }
 0x3a3   : > { %3994 = vmatprep.subr.bf16.mxu1 %v5024_v15  ;;  %4026 = vmatprep.subr.bf16.mxu0 %v5024_v15 }
 0x3a4   : > { %v5521_v41 = vpop.trf.xlu0 }
 0x3a5   : > { %v4347_v44 = vpop.trf.xlu1  ;;  %v4266_v13 = vunpack.i.l.bf16 %v5521_v41 }
 0x3a6   : > { %v4351_v45 = vunpack.i.h.bf16 %v4347_v44  ;;  %v4348_v46 = vunpack.i.l.bf16 %v4347_v44  ;;  %v4264_v44 = vunpack.i.h.bf16 %v5517_v37 }
 0x3a8   : > { %v5523_v47 = vpop.trf.xlu0  ;;  %v1554_v48 = vpack.c.bf16 %v4348_v46, %v4343_v43  ;;  %v1562_v49 = vpack.c.bf16 %v4351_v45, %v4346_v42 }
 0x3a9   : > { %v4271_v50 = vunpack.i.l.bf16 %v5523_v47  ;;  %v4352_v52 = vpop.trf.xlu1 }
 0x3aa   : > { %3995 = vmatpush3.bf16.msra.mxu1 %v1554_v48  ;;  %4027 = vmatpush3.bf16.msra.mxu0 %v1562_v49  ;;  %v4356_v55 = vunpack.i.h.bf16 %v4352_v52  ;;  %v4353_v56 = vunpack.i.l.bf16 %v4352_v52 }
 0x3ab   : > { %v4412_v53 = vpack.i.bf16 %v4271_v50, %v4251_v51  ;;  %4000 = vmatprep.subr.bf16.mxu1 %v5024_v15  ;;  %4040 = vmatprep.subr.bf16.mxu0 %v5024_v15  ;;  %v4269_v51 = vunpack.i.h.bf16 %v5521_v41 }
 0x3ac   : > { %v5529_v54 = vpop.trf.xlu0 }
 0x3ad   : > { %v4276_v58 = vunpack.i.l.bf16 %v5529_v54  ;;  %4413 = vxpose.xlu0.b32.start [1/4] (short) (narrow) %v4412_v53, 8  ;;  %v4357_v59 = vpop.trf.xlu1 }
 0x3ae   : > { %v4361_v60 = vunpack.i.h.bf16 %v4357_v59  ;;  %v4358_v61 = vunpack.i.l.bf16 %v4357_v59 }
 0x3af   : > { %v4414_v62 = vpack.i.bf16 %v4276_v58, %v4256_v57 }
 0x3b0   : > { %v5533_v63 = vpop.trf.xlu0  ;;  %v5535_v0 = vpack.c.bf16 %v4358_v61, %v4353_v56  ;;  %v5537_v1 = vpack.c.bf16 %v4361_v60, %v4356_v55 }
 0x3b1   : > { %v4281_v7 = vunpack.i.l.bf16 %v5533_v63  ;;  %4415 = vxpose.xlu0.b32.cont [2/4] (short) (narrow) %v4414_v62, 8  ;;  %v4362_v8 = vpop.trf.xlu1 }
 0x3b2   : > { %v4366_v11 = vunpack.i.h.bf16 %v4362_v8  ;;  %v4363_v12 = vunpack.i.l.bf16 %v4362_v8 }
 0x3b3   : > { %v4416_v9 = vpack.i.bf16 %v4281_v7, %v4261_v5 }
 0x3b4   : > { %v5541_v10 = vpop.trf.xlu0 }
 0x3b5   : > { %v4286_v14 = vunpack.i.l.bf16 %v5541_v10  ;;  %4417 = vxpose.xlu0.b32.cont [3/4] (short) (narrow) %v4416_v9, 8  ;;  %v4367_v16 = vpop.trf.xlu1 }
 0x3b6   : > { %v4371_v17 = vunpack.i.h.bf16 %v4367_v16  ;;  %v4368_v19 = vunpack.i.l.bf16 %v4367_v16 }
 0x3b7   : > { %v4418_v21 = vpack.i.bf16 %v4286_v14, %v4266_v13 }
 0x3b8   : > { %v4290_v22 = vpop.trf.xlu0  ;;  %v5545_v23 = vpack.c.bf16 %v4368_v19, %v4363_v12  ;;  %v5547_v24 = vpack.c.bf16 %v4371_v17, %v4366_v11 }
 0x3b9   : > { %4419 = vxpose.xlu0.b32.end [4/4] (short) (narrow) %v4418_v21, 8  ;;  %v4372_v26 = vpop.trf.xlu1  ;;  %v4291_v56 = vunpack.i.l.bf16 %v4290_v22  ;;  %v4294_v37 = vunpack.i.h.bf16 %v4290_v22 }
 0x3ba   : > { %v4376_v32 = vunpack.i.h.bf16 %v4372_v26  ;;  %v4373_v33 = vunpack.i.l.bf16 %v4372_v26 }
 0x3bc   : > { %v4295_v30 = vpop.trf.xlu0 }
 0x3bd   : > { %1289 = vxpose.xlu0.b32.start [1/4] (short) (narrow) %v4254_v27, 8  ;;  %v4377_v34 = vpop.trf.xlu1  ;;  %v4296_v62 = vunpack.i.l.bf16 %v4295_v30  ;;  %v4299_v11 = vunpack.i.h.bf16 %v4295_v30 }
 0x3be   : > { %v4381_v35 = vunpack.i.h.bf16 %v4377_v34  ;;  %v4378_v36 = vunpack.i.l.bf16 %v4377_v34 }
 0x3c0   : > { %v4300_v39 = vpop.trf.xlu0  ;;  %v5551_v40 = vpack.c.bf16 %v4378_v36, %v4373_v33  ;;  %v5553_v42 = vpack.c.bf16 %v4381_v35, %v4376_v32  ;;  %v4274_v35 = vunpack.i.h.bf16 %v5523_v47  ;;  %v4279_v36 = vunpack.i.h.bf16 %v5529_v54 }
 0x3c1   : > { %1290 = vxpose.xlu0.b32.cont [2/4] (short) (narrow) %v4259_v38, 8  ;;  %v4382_v43 = vpop.trf.xlu1  ;;  %v4301_v16 = vunpack.i.l.bf16 %v4300_v39  ;;  %v4304_v22 = vunpack.i.h.bf16 %v4300_v39  ;;  %v4284_v38 = vunpack.i.h.bf16 %v5533_v63  ;;  %v4289_v39 = vunpack.i.h.bf16 %v5541_v10 }
 0x3c2   : > { %v4386_v28 = vunpack.i.h.bf16 %v4382_v43  ;;  %v4383_v46 = vunpack.i.l.bf16 %v4382_v43 }
 0x3c4   : > { %v4305_v45 = vpop.trf.xlu0 }
 0x3c5   : > { %1291 = vxpose.xlu0.b32.cont [3/4] (short) (narrow) %v4264_v44, 8  ;;  %v4387_v48 = vpop.trf.xlu1  ;;  %v4306_v27 = vunpack.i.l.bf16 %v4305_v45  ;;  %v4309_v34 = vunpack.i.h.bf16 %v4305_v45 }
 0x3c6   : > { %v4391_v49 = vunpack.i.h.bf16 %v4387_v48  ;;  %v4388_v50 = vunpack.i.l.bf16 %v4387_v48 }
 0x3c8   : > { %v4310_v52 = vpop.trf.xlu0  ;;  %v5557_v31 = vpack.c.bf16 %v4388_v50, %v4383_v46  ;;  %v5559_v53 = vpack.c.bf16 %v4391_v49, %v4386_v28 }
 0x3c9   : > { %1292 = vxpose.xlu0.b32.end [4/4] (short) (narrow) %v4269_v51, 8  ;;  %v4311_v55 = vunpack.i.l.bf16 %v4310_v52  ;;  %v4392_v57 = vpop.trf.xlu1  ;;  %v4314_v43 = vunpack.i.h.bf16 %v4310_v52 }
 0x3ca   : > { %v4396_v60 = vunpack.i.h.bf16 %v4392_v57  ;;  %v4393_v61 = vunpack.i.l.bf16 %v4392_v57 }
 0x3cb   : > { %v4425_v58 = vpack.i.bf16 %v4311_v55, %v4291_v56 }
 0x3cc   : > { %v4315_v59 = vpop.trf.xlu0 }
 0x3cd   : > { %v4316_v5 = vunpack.i.l.bf16 %v4315_v59  ;;  %4426 = vxpose.xlu1.b32.start [1/4] (short) (narrow) %v4425_v58, 8  ;;  %1353 = vxpose.xlu0.b32.start [1/4] (short) (narrow) %v4294_v37, 8  ;;  %v4397_v7 = vpop.trf.xlu1  ;;  %v4319_v44 = vunpack.i.h.bf16 %v4315_v59 }
 0x3ce   : > { %v4401_v41 = vunpack.i.h.bf16 %v4397_v7  ;;  %v4398_v8 = vunpack.i.l.bf16 %v4397_v7 }
 0x3cf   : > { %v4427_v9 = vpack.i.bf16 %v4316_v5, %v4296_v62 }
 0x3d0   : > { %v4320_v12 = vpop.trf.xlu0  ;;  %v5561_v13 = vpack.c.bf16 %v4398_v8, %v4393_v61  ;;  %v5563_v14 = vpack.c.bf16 %v4401_v41, %v4396_v60 }
 0x3d1   : > { %v4321_v17 = vunpack.i.l.bf16 %v4320_v12  ;;  %4428 = vxpose.xlu1.b32.cont [2/4] (short) (narrow) %v4427_v9, 8  ;;  %1354 = vxpose.xlu0.b32.cont [2/4] (short) (narrow) %v4299_v11, 8  ;;  %v5565_v19 = vpop.trf.xlu1  ;;  %v4324_v28 = vunpack.i.h.bf16 %v4320_v12 }
 0x3d2   : > { %v4403_v52 = vunpack.i.l.bf16 %v5565_v19  ;;  %v4406_v58 = vunpack.i.h.bf16 %v5565_v19 }
 0x3d3   : > { %v4429_v21 = vpack.i.bf16 %v4321_v17, %v4301_v16 }
 0x3d4   : > { %v4325_v26 = vpop.trf.xlu0 }
 0x3d5   : > { %v4326_v32 = vunpack.i.l.bf16 %v4325_v26  ;;  %4430 = vxpose.xlu1.b32.cont [3/4] (short) (narrow) %v4429_v21, 8  ;;  %1355 = vxpose.xlu0.b32.cont [3/4] (short) (narrow) %v4304_v22, 8  ;;  %v5567_v33 = vpop.trf.xlu1  ;;  %v4329_v45 = vunpack.i.h.bf16 %v4325_v26 }
 0x3d6   : > { %v4411_v37 = vunpack.i.h.bf16 %v5567_v33 }
 0x3d7   : > { %v4431_v30 = vpack.i.bf16 %v4326_v32, %v4306_v27  ;;  %v3762_v27 = vld [vmem:[#allocation5 + $0x1] ss:$0 sm:$0xff] }
 0x3d9   : > { %4432 = vxpose.xlu1.b32.end [4/4] (short) (narrow) %v4431_v30, 8  ;;  %1356 = vxpose.xlu0.b32.end [4/4] (short) (narrow) %v4309_v34, 8 }
 0x3dd   : > { %1321 = vxpose.xlu1.b32.start [1/4] (short) (narrow) %v4274_v35, 8 }
 0x3e1   : > { %1322 = vxpose.xlu1.b32.cont [2/4] (short) (narrow) %v4279_v36, 8 }
 0x3e5   : > { %1323 = vxpose.xlu1.b32.cont [3/4] (short) (narrow) %v4284_v38, 8 }
 0x3e9   : > { %1324 = vxpose.xlu1.b32.end [4/4] (short) (narrow) %v4289_v39, 8 }
 0x3ed   : > { %1385 = vxpose.xlu1.b32.start [1/4] (short) (narrow) %v4314_v43, 8 }
 0x3f1   : > { %1386 = vxpose.xlu1.b32.cont [2/4] (short) (narrow) %v4319_v44, 8 }
 0x3f5   : > { %1387 = vxpose.xlu1.b32.cont [3/4] (short) (narrow) %v4324_v28, 8 }
 0x3f9   : > { %1388 = vxpose.xlu1.b32.end [4/4] (short) (narrow) %v4329_v45, 8 }
 0x42d   : > { %v4420_v46 = vpop.trf.xlu0 }
 0x42e   : > { %v4421_v47 = vunpack.i.l.bf16 %v4420_v46  ;;  %v4424_v54 = vunpack.i.h.bf16 %v4420_v46 }
 0x430   : > { %v1545_v48 = vpack.c.bf16 %v4421_v47, %v4421_v47  ;;  %v1546_v63 = vpack.c.bf16 %v4424_v54, %v4424_v54 }
 0x432   : > { %3997 = vmatmul.mubr.msk.bf16.vlgmr.msra.gmra.mrb[4].mxu1 %vm1569_vm5, %v1545_v48 }
 0x433   : > { %4001 = vmatpush3.bf16.msra.mxu1 %v5535_v0  ;;  %4004 = vmatprep.mubr.msk.bf16.mxu1 %vm5026_vm0, %v5024_v15 }
 0x434   : > { %4002 = vmatprep.subr.bf16.mxu1 %v5024_v15 }
 0x437   : > { %4003 = vmatpush3.bf16.msra.mxu1 %v5545_v23 }
 0x438   : > { %4008 = vmatprep.subr.bf16.mxu1 %v5024_v15 }
 0x43a   : > { %4005 = vmatmul.mubr.msk.bf16.vlgmr.msra.gmra.mrb[8].mxu1 %vm1569_vm5, %v1546_v63 }
 0x43b   : > { %4009 = vmatpush3.bf16.msra.mxu1 %v5551_v40  ;;  %4012 = vmatprep.mubr.msk.bf16.mxu1 %vm5026_vm0, %v5024_v15 }
 0x43c   : > { %4010 = vmatprep.subr.bf16.mxu1 %v5024_v15 }
 0x43d   : > { %v1305_v0 = vpop.trf.xlu0 }
 0x43e   : > { %v1549_v10 = vpack.c.bf16 %v1305_v0, %v1305_v0 }
 0x43f   : > { %4011 = vmatpush3.bf16.msra.mxu1 %v5557_v31  ;;  %v4408_v31 = vunpack.i.l.bf16 %v5567_v33 }
 0x440   : > { %4029 = vmatmul.mubr.msk.bf16.vlgmr.msra.gmra.mrb[4].mxu0 %vm1569_vm5, %v1549_v10  ;;  %4016 = vmatprep.subr.bf16.mxu1 %v5024_v15 }
 0x441   : > { %4041 = vmatpush3.bf16.msra.mxu0 %v5553_v42  ;;  %4044 = vmatprep.mubr.msk.bf16.mxu0 %vm5026_vm0, %v5024_v15 }
 0x442   : > { %4042 = vmatprep.subr.bf16.mxu0 %v5024_v15 }
 0x445   : > { %4043 = vmatpush3.bf16.msra.mxu0 %v5559_v53  ;;  %v1560_v53 = vpack.c.bf16 %v4408_v31, %v4403_v52 }
 0x44d   : > { %v4433_v23 = vpop.trf.xlu1  ;;  %v1369_v40 = vpop.trf.xlu0 }
 0x44e   : > { %v4434_v49 = vunpack.i.l.bf16 %v4433_v23  ;;  %v1551_v50 = vpack.c.bf16 %v1369_v40, %v1369_v40  ;;  %v4437_v42 = vunpack.i.h.bf16 %v4433_v23 }
 0x450   : > { %v1547_v51 = vpack.c.bf16 %v4434_v49, %v4434_v49  ;;  %4045 = vmatmul.mubr.msk.bf16.vlgmr.msra.gmra.mrb[8].mxu0 %vm1569_vm5, %v1551_v50  ;;  %v1548_v55 = vpack.c.bf16 %v4437_v42, %v4437_v42 }
 0x452   : > { %4013 = vmatmul.mubr.msk.bf16.vlgmr.msra.gmra.mrb[12].mxu1 %vm1569_vm5, %v1547_v51 }
 0x453   : > { %4017 = vmatpush3.bf16.msra.mxu1 %v5561_v13  ;;  %4020 = vmatprep.mubr.msk.bf16.mxu1 %vm5026_vm0, %v5024_v15 }
 0x454   : > { %4018 = vmatprep.subr.bf16.mxu1 %v5024_v15 }
 0x457   : > { %4019 = vmatpush3.bf16.msra.mxu1 %v1560_v53 }
 0x458   : > { %4032 = vmatprep.subr.bf16.mxu1 %v5024_v15 }
 0x45a   : > { %4021 = vmatmul.mubr.msk.bf16.vlgmr.msra.gmra.mrb[16].mxu1 %vm1569_vm5, %v1548_v55 }
 0x45b   : > { %4033 = vmatpush3.bf16.msra.mxu1 %v5537_v1  ;;  %4036 = vmatprep.mubr.msk.bf16.mxu1 %vm5026_vm0, %v5024_v15  ;;  %v1568_v1 = vpack.c.bf16 %v4411_v37, %v4406_v58 }
 0x45c   : > { %4034 = vmatprep.subr.bf16.mxu1 %v5024_v15 }
 0x45d   : > { %v1337_v56 = vpop.trf.xlu1 }
 0x45e   : > { %v1550_v57 = vpack.c.bf16 %v1337_v56, %v1337_v56 }
 0x45f   : > { %4035 = vmatpush3.bf16.msra.mxu1 %v5547_v24  ;;  %v3761_v24 = vld [vmem:[#allocation5] ss:$0 sm:$0xff] }
 0x460   : > { %4048 = vmatprep.subr.bf16.mxu1 %v5024_v15 }
 0x462   : > { %4037 = vmatmul.mubr.msk.bf16.vlgmr.msra.gmra.mrb[20].mxu1 %vm1569_vm5, %v1550_v57 }
 0x463   : > { %4049 = vmatpush3.bf16.msra.mxu1 %v5563_v14  ;;  %4052 = vmatprep.mubr.msk.bf16.mxu1 %vm5026_vm0, %v5024_v15 }
 0x464   : > { %4050 = vmatprep.subr.bf16.mxu1 %v5024_v15 }
 0x467   : > { %4051 = vmatpush3.bf16.msra.mxu1 %v1568_v1 }
 0x46d   : > { %v1401_v59 = vpop.trf.xlu1 }
 0x46e   : > { %v1552_v60 = vpack.c.bf16 %v1401_v59, %v1401_v59 }
 0x470   : > { %4053 = vmatmul.mubr.msk.bf16.vlgmr.msra.gmra.mrb[24].mxu1 %vm1569_vm5, %v1552_v60 }
 0x505   : > { %v1607_v61 = vpop.f32.mrb[4].mxu1 }
 0x506   : > { %v1926_v62 = vadd.f32 %v3761_v24, %v1607_v61  ;;  %v3998_v5 = vpop.f32.mrb[5].mxu1 }
 0x507   : > { %v1610_v7 = vpop.f32.mrb[6].mxu1 }
 0x508   : > { %v1935_v41 = vsel %vm1934_vm6, %v1926_v62, -inf  ;;  %v3999_v8 = vpop.f32.mrb[7].mxu1 }
 0x509   : > { %1936 = vmax.xlane.f32.xlu0 %v1935_v41 }
 0x50d   : > { %v1650_v9 = vpop.f32.mrb[8].mxu1 }
 0x50e   : > { %v1927_v11 = vadd.f32 %v3761_v24, %v1650_v9  ;;  %v4006_v12 = vpop.f32.mrb[9].mxu1 }
 0x50f   : > { %v1653_v13 = vpop.f32.mrb[10].mxu1 }
 0x510   : > { %v1938_v14 = vsel %vm1934_vm6, %v1927_v11, -inf  ;;  %v4007_v16 = vpop.f32.mrb[11].mxu1 }
 0x511   : > { %1939 = vmax.xlane.f32.xlu1 %v1938_v14 }
 0x513   : > { %v1779_v17 = vpop.f32.mrb[4].mxu0 }
 0x514   : > { %v4030_v19 = vpop.f32.mrb[5].mxu0  ;;  %v1930_v39 = vadd.f32 %v3762_v27, %v1779_v17 }
 0x515   : > { %v1782_v21 = vpop.f32.mrb[6].mxu0 }
 0x516   : > { %v4031_v22 = vpop.f32.mrb[7].mxu0  ;;  %v1947_v45 = vsel %vm1934_vm6, %v1930_v39, -inf }
 0x523   : > { %v1865_v26 = vpop.f32.mrb[8].mxu0 }
 0x524   : > { %v4046_v33 = vpop.f32.mrb[9].mxu0  ;;  %v1932_v28 = vadd.f32 %v3762_v27, %v1865_v26 }
 0x525   : > { %v1693_v32 = vpop.f32.mrb[12].mxu1  ;;  %v1868_v35 = vpop.f32.mrb[10].mxu0 }
 0x526   : > { %v1928_v30 = vadd.f32 %v3761_v24, %v1693_v32  ;;  %v4014_v34 = vpop.f32.mrb[13].mxu1  ;;  %v4047_v38 = vpop.f32.mrb[11].mxu0  ;;  %v1953_v54 = vsel %vm1934_vm6, %v1932_v28, -inf }
 0x527   : > { %v1696_v36 = vpop.f32.mrb[14].mxu1 }
 0x528   : > { %v4015_v43 = vpop.f32.mrb[15].mxu1  ;;  %v1941_v44 = vsel %vm1934_vm6, %v1928_v30, -inf }
 0x529   : > { %1942 = vmax.xlane.f32.xlu0 %v1941_v44 }
 0x52d   : > { %1948 = vmax.xlane.f32.xlu0 %v1947_v45  ;;  %v1736_v46 = vpop.f32.mrb[16].mxu1 }
 0x52e   : > { %v1929_v47 = vadd.f32 %v3761_v24, %v1736_v46  ;;  %v4022_v48 = vpop.f32.mrb[17].mxu1 }
 0x52f   : > { %v1739_v63 = vpop.f32.mrb[18].mxu1 }
 0x530   : > { %v4023_v0 = vpop.f32.mrb[19].mxu1  ;;  %v1944_v10 = vsel %vm1934_vm6, %v1929_v47, -inf }
 0x531   : > { %1954 = vmax.xlane.f32.xlu0 %v1953_v54  ;;  %1945 = vmax.xlane.f32.xlu1 %v1944_v10 }
 0x535   : > { %v1822_v23 = vpop.f32.mrb[20].mxu1 }
 0x536   : > { %v1931_v40 = vadd.f32 %v3762_v27, %v1822_v23  ;;  %v4038_v49 = vpop.f32.mrb[21].mxu1 }
 0x537   : > { %v1825_v50 = vpop.f32.mrb[22].mxu1 }
 0x538   : > { %v1950_v51 = vsel %vm1934_vm6, %v1931_v40, -inf  ;;  %v4039_v52 = vpop.f32.mrb[23].mxu1 }
 0x539   : > { %1951 = vmax.xlane.f32.xlu1 %v1950_v51 }
 0x543   : > { %v1908_v31 = vpop.f32.mrb[24].mxu1 }
 0x544   : > { %v1933_v42 = vadd.f32 %v3762_v27, %v1908_v31  ;;  %v4054_v53 = vpop.f32.mrb[25].mxu1 }
 0x545   : > { %v1911_v55 = vpop.f32.mrb[26].mxu1 }
 0x546   : > { %v1956_v56 = vsel %vm1934_vm6, %v1933_v42, -inf  ;;  %v4055_v57 = vpop.f32.mrb[27].mxu1 }
 0x547   : > { %1957 = vmax.xlane.f32.xlu1 %v1956_v56 }
 0x596   : > { %v1937_v58 = vpop.xlane.xlu0 %1936 }
 0x597   : > { %v1959_v37 = vsub.f32 %v1926_v62, %v1937_v58 }
 0x599   : > { %v1967_v1 = vmul.f32 1.442695, %v1959_v37 }
 0x59b   : > { %4685 = vpow2.f32 %v1967_v1 }
 0x59e   : > { %v1940_v59 = vpop.xlane.xlu1 %1939 }
 0x59f   : > { %v1960_v60 = vsub.f32 %v1927_v11, %v1940_v59 }
 0x5a1   : > { %v1969_v24 = vmul.f32 1.442695, %v1960_v60 }
 0x5a3   : > { %4687 = vpow2.f32 %v1969_v24 }
 0x5a5   : > { %v4686_v61 = vpop.eup %4685 }
 0x5a6   : > { %v1983_v5 = vsel %vm1934_vm6, %v4686_v61, 0.0 }
 0x5a7   : > { %1984 = vadd.xlane.f32.xlu0 %v1983_v5 }
 0x5ad   : > { %v4688_v7 = vpop.eup %4687 }
 0x5ae   : > { %v1986_v41 = vsel %vm1934_vm6, %v4688_v7, 0.0 }
 0x5af   : > { %1987 = vadd.xlane.f32.xlu1 %v1986_v41 }
 0x5b6   : > { %v1943_v8 = vpop.xlane.xlu0 %1942 }
 0x5b7   : > { %v1961_v9 = vsub.f32 %v1928_v30, %v1943_v8 }
 0x5b9   : > { %v1971_v12 = vmul.f32 1.442695, %v1961_v9 }
 0x5ba   : > { %v1949_v13 = vpop.xlane.xlu0 %1948 }
 0x5bb   : > { %4689 = vpow2.f32 %v1971_v12  ;;  %v1963_v62 = vsub.f32 %v1930_v39, %v1949_v13 }
 0x5bd   : > { %v1975_v14 = vmul.f32 1.442695, %v1963_v62 }
 0x5be   : > { %v1955_v16 = vpop.xlane.xlu0 %1954  ;;  %v1946_v17 = vpop.xlane.xlu1 %1945 }
 0x5bf   : > { %4691 = vpow2.f32 %v1975_v14  ;;  %v1965_v11 = vsub.f32 %v1932_v28, %v1955_v16  ;;  %v1962_v19 = vsub.f32 %v1929_v47, %v1946_v17 }
 0x5c1   : > { %v1979_v21 = vmul.f32 1.442695, %v1965_v11  ;;  %v1973_v22 = vmul.f32 1.442695, %v1962_v19 }
 0x5c3   : > { %4693 = vpow2.f32 %v1979_v21 }
 0x5c4   : > { %4695 = vpow2.f32 %v1973_v22 }
 0x5c5   : > { %v4690_v26 = vpop.eup %4689 }
 0x5c6   : > { %v1952_v27 = vpop.xlane.xlu1 %1951  ;;  %v1989_v32 = vsel %vm1934_vm6, %v4690_v26, 0.0 }
 0x5c7   : > { %v1964_v33 = vsub.f32 %v1931_v40, %v1952_v27  ;;  %1990 = vadd.xlane.f32.xlu0 %v1989_v32 }
 0x5c9   : > { %v5628_v30 = vpop.eup %4691  ;;  %v1977_v34 = vmul.f32 1.442695, %v1964_v33 }
 0x5ca   : > { %v1995_v35 = vsel %vm1934_vm6, %v5628_v30, 0.0 }
 0x5cb   : > { %4697 = vpow2.f32 %v1977_v34  ;;  %1996 = vadd.xlane.f32.xlu0 %v1995_v35 }
 0x5cd   : > { %v5632_v36 = vpop.eup %4693 }
 0x5ce   : > { %v4696_v38 = vpop.eup %4695  ;;  %v2001_v39 = vsel %vm1934_vm6, %v5632_v36, 0.0 }
 0x5cf   : > { %2002 = vadd.xlane.f32.xlu0 %v2001_v39  ;;  %v1992_v43 = vsel %vm1934_vm6, %v4696_v38, 0.0 }
 0x5d0   : > { %1993 = vadd.xlane.f32.xlu1 %v1992_v43 }
 0x5d4   : > { %v1958_v44 = vpop.xlane.xlu1 %1957 }
 0x5d5   : > { %v5637_v28 = vpop.eup %4697  ;;  %v1966_v45 = vsub.f32 %v1933_v42, %v1958_v44 }
 0x5d6   : > { %v1998_v46 = vsel %vm1934_vm6, %v5637_v28, 0.0 }
 0x5d7   : > { %v1981_v47 = vmul.f32 1.442695, %v1966_v45  ;;  %1999 = vadd.xlane.f32.xlu1 %v1998_v46 }
 0x5d9   : > { %4699 = vpow2.f32 %v1981_v47 }
 0x5e3   : > { %v5641_v48 = vpop.eup %4699 }
 0x5e4   : > { %v2004_v54 = vsel %vm1934_vm6, %v5641_v48, 0.0 }
 0x5e5   : > { %2005 = vadd.xlane.f32.xlu1 %v2004_v54 }
 0x5fc   : > { %4439 = vxpose.xlu0.b32.start.end [1/1] (short) %v4438_v25, 128 }
 0x634   : > { %v1985_v63 = vpop.xlane.xlu0 %1984 }
 0x635   : > { %4701 = vrcp.f32 %v1985_v63 }
 0x63c   : > { %v1988_v0 = vpop.xlane.xlu1 %1987 }
 0x63d   : > { %4703 = vrcp.f32 %v1988_v0 }
 0x63f   : > { %v4702_v10 = vpop.eup %4701 }
 0x640   : > { %v2015_v23 = vmul.f32 %v4702_v10, %v4686_v61 }
 0x642   : > { %v2039_v40 = vpack.c.bf16 %v2015_v23, %v2015_v23 }
 0x644   : > { %4124 = vmatprep.subr.msk.bf16.mxu0 %vm1934_vm6, %v2039_v40  ;;  %v2054_v49 = vsel %vm1934_vm6, %v2039_v40, 0 }
 0x645   : > { %4057 = vmatpush3.bf16.xpose.msra.mxu0 %v2054_v49 }
 0x647   : > { %v4704_v50 = vpop.eup %4703 }
 0x648   : > { %v2016_v51 = vmul.f32 %v4704_v50, %v4688_v7 }
 0x64a   : > { %v2040_v52 = vpack.c.bf16 %v2016_v51, %v2016_v51 }
 0x64c   : > { %4125 = vmatprep.subr.msk.bf16.mxu1 %vm1934_vm6, %v2040_v52  ;;  %v2112_v18 = vsel %vm1934_vm6, %v2040_v52, 0 }
 0x64d   : > { %4063 = vmatpush3.bf16.xpose.msra.mxu1 %v2112_v18 }
 0x654   : > { %v1991_v20 = vpop.xlane.xlu0 %1990 }
 0x655   : > { %4705 = vrcp.f32 %v1991_v20 }
 0x658   : > { %v1997_v58 = vpop.xlane.xlu0 %1996 }
 0x65c   : > { %v2003_v37 = vpop.xlane.xlu0 %2002 }
 0x65d   : > { %v1994_v25 = vpop.xlane.xlu1 %1993 }
 0x65e   : > { %4707 = vrcp.f32 %v1994_v25 }
 0x65f   : > { %v4706_v31 = vpop.eup %4705  ;;  %4709 = vrcp.f32 %v1997_v58 }
 0x660   : > { %v2017_v42 = vmul.f32 %v4706_v31, %v4690_v26 }
 0x662   : > { %v2041_v53 = vpack.c.bf16 %v2017_v42, %v2017_v42 }
 0x664   : > { %4126 = vmatprep.subr.msk.bf16.mxu0 %vm1934_vm6, %v2041_v53  ;;  %v2000_v41 = vpop.xlane.xlu1 %1999  ;;  %v2170_v16 = vsel %vm1934_vm6, %v2041_v53, 0 }
 0x665   : > { %4711 = vrcp.f32 %v2000_v41 }
 0x666   : > { %4713 = vrcp.f32 %v2003_v37 }
 0x668   : > { %v4708_v55 = vpop.eup %4707 }
 0x669   : > { %v2018_v56 = vmul.f32 %v4708_v55, %v4696_v38  ;;  %v4710_v7 = vpop.eup %4709 }
 0x66a   : > { %v2019_v9 = vmul.f32 %v4710_v7, %v5628_v30 }
 0x66b   : > { %v2042_v57 = vpack.c.bf16 %v2018_v56, %v2018_v56 }
 0x66c   : > { %v2043_v17 = vpack.c.bf16 %v2019_v9, %v2019_v9 }
 0x66d   : > { %4127 = vmatprep.subr.msk.bf16.mxu1 %vm1934_vm6, %v2042_v57  ;;  %v2228_v39 = vsel %vm1934_vm6, %v2042_v57, 0 }
 0x66e   : > { %v2286_v20 = vsel %vm1934_vm6, %v2043_v17, 0 }
 0x66f   : > { %v4712_v27 = vpop.eup %4711 }
 0x670   : > { %v2020_v33 = vmul.f32 %v4712_v27, %v5637_v28  ;;  %v4714_v54 = vpop.eup %4713 }
 0x671   : > { %v2021_v23 = vmul.f32 %v4714_v54, %v5632_v36 }
 0x672   : > { %v2044_v43 = vpack.c.bf16 %v2020_v33, %v2020_v33  ;;  %v2006_v63 = vpop.xlane.xlu1 %2005 }
 0x673   : > { %4715 = vrcp.f32 %v2006_v63  ;;  %v2045_v25 = vpack.c.bf16 %v2021_v23, %v2021_v23 }
 0x67c   : > { %v4440_v1 = vpop.trf.xlu0 }
 0x67d   : > { %v4441_v60 = vunpack.i.l.bf16 %v4440_v1  ;;  %v4444_v50 = vunpack.i.h.bf16 %v4440_v1 }
 0x680   : > { %v4445_v59 = vpop.trf.xlu0 }
 0x681   : > { %v4446_v24 = vunpack.i.l.bf16 %v4445_v59  ;;  %v4449_v0 = vunpack.i.h.bf16 %v4445_v59 }
 0x683   : > { %v2023_v61 = vpack.c.bf16 %v4446_v24, %v4441_v60  ;;  %v2031_v18 = vpack.c.bf16 %v4449_v0, %v4444_v50  ;;  %v4716_v60 = vpop.eup %4715  ;;  %v2402_v24 = vsel %vm1934_vm6, %v2045_v25, 0 }
 0x684   : > { %v5654_v5 = vpop.trf.xlu0 }
 0x685   : > { %4058 = vmatprep.mubr.msk.bf16.mxu0 %vm1934_vm6, %v2023_v61  ;;  %v4451_v12 = vunpack.i.l.bf16 %v5654_v5  ;;  %v4454_v36 = vunpack.i.h.bf16 %v5654_v5 }
 0x688   : > { %v5657_v8 = vpop.trf.xlu0 }
 0x689   : > { %v4456_v13 = vunpack.i.l.bf16 %v5657_v8  ;;  %v4459_v31 = vunpack.i.h.bf16 %v5657_v8  ;;  %v2022_v8 = vmul.f32 %v4716_v60, %v5641_v48 }
 0x68b   : > { %v2024_v62 = vpack.c.bf16 %v4456_v13, %v4451_v12  ;;  %v2032_v58 = vpack.c.bf16 %v4459_v31, %v4454_v36 }
 0x68c   : > { %v5662_v14 = vpop.trf.xlu0 }
 0x68d   : > { %4059 = vmatmul.mubr.msk.bf16.vlgmr.msra.gmra.mrb[12].mxu0 %vm1934_vm6, %v2024_v62  ;;  %v4461_v19 = vunpack.i.l.bf16 %v5662_v14  ;;  %v4464_v13 = vunpack.i.h.bf16 %v5662_v14 }
 0x68e   : > { %4069 = vmatpush3.bf16.xpose.msra.mxu0 %v2170_v16 }
 0x68f   : > { %4128 = vmatprep.subr.msk.bf16.mxu0 %vm1934_vm6, %v2043_v17 }
 0x690   : > { %v5667_v11 = vpop.trf.xlu0 }
 0x691   : > { %v4466_v21 = vunpack.i.l.bf16 %v5667_v11  ;;  %v4469_v5 = vunpack.i.h.bf16 %v5667_v11 }
 0x693   : > { %v2025_v22 = vpack.c.bf16 %v4466_v21, %v4461_v19  ;;  %v2033_v17 = vpack.c.bf16 %v4469_v5, %v4464_v13  ;;  %v2344_v19 = vsel %vm1934_vm6, %v2044_v43, 0  ;;  %v2046_v21 = vpack.c.bf16 %v2022_v8, %v2022_v8 }
 0x694   : > { %v5671_v26 = vpop.trf.xlu0 }
 0x695   : > { %4064 = vmatprep.mubr.msk.bf16.mxu1 %vm1934_vm6, %v2025_v22  ;;  %v4471_v30 = vunpack.i.l.bf16 %v5671_v26  ;;  %v4474_v14 = vunpack.i.h.bf16 %v5671_v26  ;;  %v4589_v26 = vld [vmem:[%s5427_s6] sm:$0xff]  }
 0x698   : > { %v5674_v32 = vpop.trf.xlu0 }
 0x699   : > { %v4476_v34 = vunpack.i.l.bf16 %v5674_v32  ;;  %v4479_v11 = vunpack.i.h.bf16 %v5674_v32 }
 0x69b   : > { %v2026_v35 = vpack.c.bf16 %v4476_v34, %v4471_v30  ;;  %v2034_v27 = vpack.c.bf16 %v4479_v11, %v4474_v14  ;;  %v2460_v30 = vsel %vm1934_vm6, %v2046_v21, 0 }
 0x69c   : > { %v4480_v38 = vpop.trf.xlu0 }
 0x69d   : > { %4065 = vmatmul.mubr.msk.bf16.vlgmr.msra.gmra.mrb[28].mxu1 %vm1934_vm6, %v2026_v35  ;;  %v4481_v45 = vunpack.i.l.bf16 %v4480_v38  ;;  %v4484_v57 = vunpack.i.h.bf16 %v4480_v38  ;;  %v4590_v38 = vld [vmem:[%s5427_s6 + $0x8] sm:$0xff]  }
 0x69e   : > { %4075 = vmatpush3.bf16.xpose.msra.mxu1 %v2228_v39  ;;  %v4591_v39 = vld [vmem:[%s5427_s6 + $0x10] sm:$0xff]  }
 0x69f   : > { %4129 = vmatprep.subr.msk.bf16.mxu1 %vm1934_vm6, %v2044_v43  ;;  %v4592_v43 = vld [vmem:[%s5427_s6 + $0x18] sm:$0xff]  }
 0x6a0   : > { %v4485_v44 = vpop.trf.xlu0 }
 0x6a1   : > { %v4486_v46 = vunpack.i.l.bf16 %v4485_v44  ;;  %v4489_v42 = vunpack.i.h.bf16 %v4485_v44  ;;  %v4593_v44 = vld [vmem:[%s5427_s6 + $0x20] sm:$0xff]  }
 0x6a3   : > { %v2027_v47 = vpack.c.bf16 %v4486_v46, %v4481_v45  ;;  %v2035_v59 = vpack.c.bf16 %v4489_v42, %v4484_v57  ;;  %v4594_v45 = vld [vmem:[%s5427_s6 + $0x28] sm:$0xff]   ;;  %v4595_v46 = vld [vmem:[%s5427_s6 + $0x30] sm:$0xff]  }
 0x6a4   : > { %v4490_v28 = vpop.trf.xlu0 }
 0x6a5   : > { %4070 = vmatprep.mubr.msk.bf16.mxu0 %vm1934_vm6, %v2027_v47  ;;  %v4491_v40 = vunpack.i.l.bf16 %v4490_v28  ;;  %v4494_v7 = vunpack.i.h.bf16 %v4490_v28 }
 0x6a8   : > { %v4495_v10 = vpop.trf.xlu0 }
 0x6a9   : > { %v4496_v49 = vunpack.i.l.bf16 %v4495_v10  ;;  %v4499_v61 = vunpack.i.h.bf16 %v4495_v10 }
 0x6ab   : > { %v2028_v51 = vpack.c.bf16 %v4496_v49, %v4491_v40  ;;  %v2036_v62 = vpack.c.bf16 %v4499_v61, %v4494_v7 }
 0x6ac   : > { %v4500_v52 = vpop.trf.xlu0 }
 0x6ad   : > { %4071 = vmatmul.mubr.msk.bf16.vlgmr.msra.gmra.mrb[16].mxu0 %vm1934_vm6, %v2028_v51  ;;  %v4501_v55 = vunpack.i.l.bf16 %v4500_v52  ;;  %v4504_v22 = vunpack.i.h.bf16 %v4500_v52 }
 0x6ae   : > { %4081 = vmatpush3.bf16.xpose.msra.mxu0 %v2286_v20  ;;  %4082 = vmatprep.mubr.msk.bf16.mxu0 %vm1934_vm6, %v2031_v18 }
 0x6af   : > { %4130 = vmatprep.subr.msk.bf16.mxu0 %vm1934_vm6, %v2045_v25 }
 0x6b0   : > { %v4505_v53 = vpop.trf.xlu0 }
 0x6b1   : > { %v4506_v56 = vunpack.i.l.bf16 %v4505_v53  ;;  %v4509_v48 = vunpack.i.h.bf16 %v4505_v53 }
 0x6b3   : > { %v2029_v37 = vpack.c.bf16 %v4506_v56, %v4501_v55  ;;  %v2037_v33 = vpack.c.bf16 %v4509_v48, %v4504_v22  ;;  %v4596_v56 = vld [vmem:[%s5427_s6 + $0x38] sm:$0xff]  }
 0x6b4   : > { %v4510_v1 = vpop.trf.xlu0 }
 0x6b5   : > { %4076 = vmatprep.mubr.msk.bf16.mxu1 %vm1934_vm6, %v2029_v37  ;;  %4083 = vmatmul.mubr.msk.bf16.vlgmr.msra.gmra.mrb[20].mxu0 %vm1934_vm6, %v2032_v58  ;;  %v4511_v9 = vunpack.i.l.bf16 %v4510_v1  ;;  %v4514_v34 = vunpack.i.h.bf16 %v4510_v1 }
 0x6b6   : > { %4093 = vmatpush3.bf16.xpose.msra.mxu0 %v2402_v24  ;;  %4094 = vmatprep.mubr.msk.bf16.mxu0 %vm1934_vm6, %v2035_v59 }
 0x6b7   : > { %4104 = vmatprep.subr.bf16.mxu0 %v5024_v15 }
 0x6b8   : > { %v4515_v41 = vpop.trf.xlu0 }
 0x6b9   : > { %v4516_v12 = vunpack.i.l.bf16 %v4515_v41  ;;  %v4519_v32 = vunpack.i.h.bf16 %v4515_v41 }
 0x6bb   : > { %v2030_v16 = vpack.c.bf16 %v4516_v12, %v4511_v9  ;;  %v2038_v35 = vpack.c.bf16 %v4519_v32, %v4514_v34 }
 0x6bd   : > { %4077 = vmatmul.mubr.msk.bf16.vlgmr.msra.gmra.mrb[32].mxu1 %vm1934_vm6, %v2030_v16  ;;  %4095 = vmatmul.mubr.msk.bf16.vlgmr.msra.gmra.mrb[24].mxu0 %vm1934_vm6, %v2036_v62 }
 0x6be   : > { %4087 = vmatpush3.bf16.xpose.msra.mxu1 %v2344_v19  ;;  %4088 = vmatprep.mubr.msk.bf16.mxu1 %vm1934_vm6, %v2033_v17 }
 0x6bf   : > { %4131 = vmatprep.subr.msk.bf16.mxu1 %vm1934_vm6, %v2046_v21  ;;  %4120 = vmatprep.mubr.msk.bf16.mxu0 %vm5026_vm0, %v5024_v15 }
 0x6c0   : > { %4105 = vmatpush3.bf16.msra.mxu0 %v4589_v26 }
 0x6c1   : > { %4106 = vmatprep.subr.bf16.mxu0 %v5024_v15 }
 0x6c4   : > { %4107 = vmatpush3.bf16.msra.mxu0 %v4590_v38  ;;  %v3779_v38 = vld [vmem:[%s6012_s9] ss:$0 sm:$0xff] }
 0x6c5   : > { %4089 = vmatmul.mubr.msk.bf16.vlgmr.msra.gmra.mrb[36].mxu1 %vm1934_vm6, %v2034_v27  ;;  %4108 = vmatprep.subr.bf16.mxu0 %v5024_v15 }
 0x6c6   : > { %4099 = vmatpush3.bf16.xpose.msra.mxu1 %v2460_v30  ;;  %4100 = vmatprep.mubr.msk.bf16.mxu1 %vm1934_vm6, %v2037_v33 }
 0x6c8   : > { %4109 = vmatpush3.bf16.msra.mxu0 %v4591_v39 }
 0x6c9   : > { %4110 = vmatprep.subr.bf16.mxu0 %v5024_v15 }
 0x6cc   : > { %4111 = vmatpush3.bf16.msra.mxu0 %v4592_v43 }
 0x6cd   : > { %4101 = vmatmul.mubr.msk.bf16.vlgmr.msra.gmra.mrb[40].mxu1 %vm1934_vm6, %v2038_v35  ;;  %4112 = vmatprep.subr.bf16.mxu0 %v5024_v15 }
 0x6ce   : > { %2991 = vmatprep.mubr.bf16.mxu1 %v5025_v29 }
 0x6d0   : > { %4113 = vmatpush3.bf16.msra.mxu0 %v4593_v44 }
 0x6d1   : > { %4114 = vmatprep.subr.bf16.mxu0 %v5024_v15 }
 0x6d4   : > { %4115 = vmatpush3.bf16.msra.mxu0 %v4594_v45 }
 0x6d5   : > { %4116 = vmatprep.subr.bf16.mxu0 %v5024_v15 }
 0x6d8   : > { %4117 = vmatpush3.bf16.msra.mxu0 %v4595_v46  ;;  %v4741_v46 = vld [vmem:[#allocation11] sm:$0xff] }
 0x6d9   : > { %4118 = vmatprep.subr.bf16.mxu0 %v5024_v15 }
 0x6dc   : > { %4119 = vmatpush3.bf16.msra.mxu0 %v4596_v56  ;;  %v4611_v56 = vld [vmem:[%s5429_s0 + $0x44] ss:$16 sps:$4 sm:$0xff]  }
 0x760   : > { %v4060_v47 = vpop.f32.mrb[12].mxu0 }
 0x761   : > { %v2090_v28 = vpop.f32.mrb[13].mxu0 }
 0x762   : > { %v4061_v54 = vpop.f32.mrb[14].mxu0 }
 0x763   : > { %v2093_v63 = vpop.f32.mrb[15].mxu0 }
 0x770   : > { %v4066_v0 = vpop.f32.mrb[28].mxu1 }
 0x771   : > { %v2148_v10 = vpop.f32.mrb[29].mxu1 }
 0x772   : > { %v4067_v23 = vpop.f32.mrb[30].mxu1 }
 0x773   : > { %v2151_v40 = vpop.f32.mrb[31].mxu1 }
 0x780   : > { %v4072_v49 = vpop.f32.mrb[16].mxu0 }
 0x781   : > { %v2206_v50 = vpop.f32.mrb[17].mxu0 }
 0x782   : > { %v4073_v51 = vpop.f32.mrb[18].mxu0 }
 0x783   : > { %v2209_v52 = vpop.f32.mrb[19].mxu0 }
 0x788   : > { %v4084_v18 = vpop.f32.mrb[20].mxu0 }
 0x789   : > { %v4524_v20 = vpack.i.bf16 %v4084_v18, %v4060_v47  ;;  %v2322_v25 = vpop.f32.mrb[21].mxu0  ;;  %v4599_v18 = vld [vmem:[%s5429_s0 + $0x4] ss:$16 sps:$4 sm:$0xff]  }
 0x78a   : > { %v4520_v31 = vpack.i.bf16 %v2322_v25, %v2090_v28  ;;  %v4085_v36 = vpop.f32.mrb[22].mxu0  ;;  %v4597_v25 = vld [vmem:[%s5429_s0] ss:$16 sps:$4 sm:$0xff]   ;;  %2959 = vmatprep.subr.bf16.mxu1 %v4599_v18 }
 0x78b   : > { %v4526_v42 = vpack.i.bf16 %v4085_v36, %v4061_v54  ;;  %v2325_v53 = vpop.f32.mrb[23].mxu0  ;;  %2960 = vmatpush1.bf16.msra.mxu1 %v4597_v25  ;;  %v4605_v36 = vld [vmem:[%s5429_s0 + $0x24] ss:$16 sps:$4 sm:$0xff]  }
 0x78c   : > { %v4522_v55 = vpack.i.bf16 %v2325_v53, %v2093_v63  ;;  %4521 = vxpose.xlu1.b32.start [1/16] (narrow) %v4520_v31, 8  ;;  %v4742_v63 = vld [vmem:[#allocation11 + $0x8] sm:$0xff]  ;;  %v4603_v53 = vld [vmem:[%s5429_s0 + $0x20] ss:$16 sps:$4 sm:$0xff]   ;;  %2961 = vmatprep.subr.bf16.mxu1 %v4605_v36 }
 0x78d   : > { %v4600_v31 = vld [vmem:[%s5429_s0 + $0x8] ss:$16 sps:$4 sm:$0xff]   ;;  %v4648_v36 = vld [vmem:[%s5431_s3 + $0x80] sm:$0xff]  }
 0x78f   : > { %2962 = vmatpush1.bf16.msra.mxu1 %v4603_v53  ;;  %v4650_v53 = vld [vmem:[%s5431_s3 + $0xc8] sm:$0xff]  }
 0x790   : > { %v4096_v15 = vpop.f32.mrb[24].mxu0  ;;  %4523 = vxpose.xlu1.b32.cont [2/16] (narrow) %v4522_v55, 8  ;;  %v4078_v57 = vpop.f32.mrb[32].mxu1  ;;  %v4606_v55 = vld [vmem:[%s5429_s0 + $0x28] ss:$16 sps:$4 sm:$0xff]   ;;  %2963 = vmatprep.subr.bf16.mxu1 %v4611_v56 }
 0x791   : > { %v4540_v58 = vpack.i.bf16 %v4096_v15, %v4072_v49  ;;  %v2264_v37 = vpop.f32.mrb[33].mxu1  ;;  %v2438_v1 = vpop.f32.mrb[25].mxu0  ;;  %v4614_v15 = vld [vmem:[%s5429_s0 + $0x4c] ss:$16 sps:$4 sm:$0xff]  }
 0x792   : > { %v4536_v59 = vpack.i.bf16 %v2438_v1, %v2206_v50  ;;  %v4079_v60 = vpop.f32.mrb[34].mxu1  ;;  %v4097_v24 = vpop.f32.mrb[26].mxu0  ;;  %v4620_v1 = vld [vmem:[%s5429_s0 + $0x6c] ss:$16 sps:$4 sm:$0xff]  }
 0x793   : > { %v4542_v61 = vpack.i.bf16 %v4097_v24, %v4073_v51  ;;  %v2267_v5 = vpop.f32.mrb[35].mxu1  ;;  %v2441_v7 = vpop.f32.mrb[27].mxu0  ;;  %v4623_v24 = vld [vmem:[%s5429_s0 + $0x84] ss:$16 sps:$4 sm:$0xff]   ;;  %v4652_v56 = vld [vmem:[%s5431_s3 + $0x88] sm:$0xff]  }
 0x794   : > { %v4538_v41 = vpack.i.bf16 %v2441_v7, %v2209_v52  ;;  %4525 = vxpose.xlu1.b32.cont [3/16] (narrow) %v4524_v20, 8  ;;  %v4602_v20 = vld [vmem:[%s5429_s0 + $0xc] ss:$16 sps:$4 sm:$0xff]   ;;  %v4624_v7 = vld [vmem:[%s5429_s0 + $0x88] ss:$16 sps:$4 sm:$0xff]  }
 0x795   : > { %3002 = vmatprep.subr.bf16.mxu0 %v4602_v20 }
 0x798   : > { %4527 = vxpose.xlu1.b32.cont [4/16] (narrow) %v4526_v42, 8  ;;  %v4090_v8 = vpop.f32.mrb[36].mxu1  ;;  %v4608_v42 = vld [vmem:[%s5429_s0 + $0x2c] ss:$16 sps:$4 sm:$0xff]  }
 0x799   : > { %v4532_v9 = vpack.i.bf16 %v4090_v8, %v4066_v0  ;;  %v2380_v12 = vpop.f32.mrb[37].mxu1  ;;  %v4632_v8 = vld [vmem:[%s5429_s0 + $0xac] ss:$16 sps:$4 sm:$0xff]  }
 0x79a   : > { %v4528_v13 = vpack.i.bf16 %v2380_v12, %v2148_v10  ;;  %v4091_v62 = vpop.f32.mrb[38].mxu1  ;;  %v4630_v12 = vld [vmem:[%s5429_s0 + $0xa8] ss:$16 sps:$4 sm:$0xff]  }
 0x79b   : > { %v4534_v16 = vpack.i.bf16 %v4091_v62, %v4067_v23  ;;  %v2383_v17 = vpop.f32.mrb[39].mxu1  ;;  %v4638_v62 = vld [vmem:[%s5429_s0 + $0xcc] ss:$16 sps:$4 sm:$0xff]  }
 0x79c   : > { %v4530_v19 = vpack.i.bf16 %v2383_v17, %v2151_v40  ;;  %4529 = vxpose.xlu1.b32.cont [5/16] (narrow) %v4528_v13, 8  ;;  %v4635_v13 = vld [vmem:[%s5429_s0 + $0xc4] ss:$16 sps:$4 sm:$0xff]   ;;  %v4636_v17 = vld [vmem:[%s5429_s0 + $0xc8] ss:$16 sps:$4 sm:$0xff]  }
 0x7a0   : > { %4531 = vxpose.xlu1.b32.cont [6/16] (narrow) %v4530_v19, 8  ;;  %v4102_v21 = vpop.f32.mrb[40].mxu1  ;;  %v4641_v19 = vld [vmem:[%s5429_s0 + $0xe4] ss:$16 sps:$4 sm:$0xff]  }
 0x7a1   : > { %v4548_v11 = vpack.i.bf16 %v4102_v21, %v4078_v57  ;;  %v2496_v48 = vpop.f32.mrb[41].mxu1  ;;  %v4609_v57 = vld [vmem:[%s5429_s0 + $0x40] ss:$16 sps:$4 sm:$0xff]   ;;  %v4644_v21 = vld [vmem:[%s5429_s0 + $0xec] ss:$16 sps:$4 sm:$0xff]  }
 0x7a2   : > { %v4544_v14 = vpack.i.bf16 %v2496_v48, %v2264_v37  ;;  %v4103_v22 = vpop.f32.mrb[42].mxu1  ;;  %2964 = vmatpush1.bf16.msra.mxu1 %v4609_v57  ;;  %v4617_v37 = vld [vmem:[%s5429_s0 + $0x64] ss:$16 sps:$4 sm:$0xff]   ;;  %v4642_v48 = vld [vmem:[%s5429_s0 + $0xe8] ss:$16 sps:$4 sm:$0xff]  }
 0x7a3   : > { %v4550_v27 = vpack.i.bf16 %v4103_v22, %v4079_v60  ;;  %v2499_v33 = vpop.f32.mrb[43].mxu1  ;;  %v4618_v60 = vld [vmem:[%s5429_s0 + $0x68] ss:$16 sps:$4 sm:$0xff]   ;;  %2965 = vmatprep.subr.bf16.mxu1 %v4617_v37  ;;  %v4654_v57 = vld [vmem:[%s5431_s3 + $0xd0] sm:$0xff]  }
 0x7a4   : > { %v4546_v30 = vpack.i.bf16 %v2499_v33, %v2267_v5  ;;  %4533 = vxpose.xlu1.b32.cont [7/16] (narrow) %v4532_v9, 8  ;;  %v4621_v5 = vld [vmem:[%s5429_s0 + $0x80] ss:$16 sps:$4 sm:$0xff]  }
 0x7a5   : > { %v4627_v9 = vld [vmem:[%s5429_s0 + $0xa0] ss:$16 sps:$4 sm:$0xff]  }
 0x7a6   : > { %v4656_v37 = vld [vmem:[%s5431_s3 + $0x90] sm:$0xff]  }
 0x7a8   : > { %4535 = vxpose.xlu1.b32.cont [8/16] (narrow) %v4534_v16, 8  ;;  %v4633_v16 = vld [vmem:[%s5429_s0 + $0xc0] ss:$16 sps:$4 sm:$0xff]  }
 0x7ac   : > { %4537 = vxpose.xlu1.b32.cont [9/16] (narrow) %v4536_v59, 8  ;;  %v4615_v59 = vld [vmem:[%s5429_s0 + $0x60] ss:$16 sps:$4 sm:$0xff]  }
 0x7ad   : > { %2966 = vmatpush1.bf16.msra.mxu1 %v4615_v59  ;;  %v4658_v59 = vld [vmem:[%s5431_s3 + $0xd8] sm:$0xff]  }
 0x7ae   : > { %2967 = vmatprep.subr.bf16.mxu1 %v4623_v24  ;;  %v4660_v24 = vld [vmem:[%s5431_s3 + $0x98] sm:$0xff]  }
 0x7b0   : > { %4539 = vxpose.xlu1.b32.cont [10/16] (narrow) %v4538_v41, 8  ;;  %v4629_v41 = vld [vmem:[%s5429_s0 + $0xa4] ss:$16 sps:$4 sm:$0xff]  }
 0x7b1   : > { %2968 = vmatpush1.bf16.msra.mxu1 %v4621_v5  ;;  %v4662_v5 = vld [vmem:[%s5431_s3 + $0xe0] sm:$0xff]  }
 0x7b2   : > { %2969 = vmatprep.subr.bf16.mxu1 %v4629_v41  ;;  %v4664_v41 = vld [vmem:[%s5431_s3 + $0xa0] sm:$0xff]  }
 0x7b4   : > { %4541 = vxpose.xlu1.b32.cont [11/16] (narrow) %v4540_v58, 8  ;;  %v4612_v58 = vld [vmem:[%s5429_s0 + $0x48] ss:$16 sps:$4 sm:$0xff]  }
 0x7b5   : > { %2970 = vmatpush1.bf16.msra.mxu1 %v4627_v9  ;;  %v4666_v9 = vld [vmem:[%s5431_s3 + $0xe8] sm:$0xff]  }
 0x7b6   : > { %2971 = vmatprep.subr.bf16.mxu1 %v4635_v13  ;;  %v4668_v13 = vld [vmem:[%s5431_s3 + $0xa8] sm:$0xff]  }
 0x7b8   : > { %4543 = vxpose.xlu1.b32.cont [12/16] (narrow) %v4542_v61, 8  ;;  %v4626_v61 = vld [vmem:[%s5429_s0 + $0x8c] ss:$16 sps:$4 sm:$0xff]  }
 0x7b9   : > { %2972 = vmatpush1.bf16.msra.mxu1 %v4633_v16  ;;  %v4670_v16 = vld [vmem:[%s5431_s3 + $0xf0] sm:$0xff]  }
 0x7ba   : > { %2973 = vmatprep.subr.bf16.mxu1 %v4641_v19  ;;  %v4672_v19 = vld [vmem:[%s5431_s3 + $0xb0] sm:$0xff]  }
 0x7bc   : > { %4545 = vxpose.xlu1.b32.cont [13/16] (narrow) %v4544_v14, 8 }
 0x7c0   : > { %4547 = vxpose.xlu1.b32.cont [14/16] (narrow) %v4546_v30, 8 }
 0x7c4   : > { %4549 = vxpose.xlu1.b32.cont [15/16] (narrow) %v4548_v11, 8  ;;  %v4639_v11 = vld [vmem:[%s5429_s0 + $0xe0] ss:$16 sps:$4 sm:$0xff]  }
 0x7c5   : > { %2974 = vmatpush1.bf16.msra.mxu1 %v4639_v11  ;;  %v4674_v11 = vld [vmem:[%s5431_s3 + $0xf8] sm:$0xff]  }
 0x7c8   : > { %4551 = vxpose.xlu1.b32.end [16/16] (narrow) %v4550_v27, 8 }
 0x80c   : > { %v4552_v32 = vpop.trf.xlu1 }
 0x80d   : > { %v4556_v34 = vunpack.i.h.bf16 %v4552_v32  ;;  %v4553_v35 = vunpack.i.l.bf16 %v4552_v32 }
 0x80f   : > { %v2575_v26 = vpack.c.bf16 %v4556_v34, %v4553_v35 }
 0x811   : > { %4121 = vmatmul.mubr.bf16.vlgmr.msra.gmra.mrb[28].mxu0 %v2575_v26 }
 0x812   : > { %3034 = vmatprep.mubr.bf16.mxu0 %v5025_v29  ;;  %3003 = vmatpush1.bf16.msra.mxu0 %v4600_v31  ;;  %v4647_v31 = vld [vmem:[%s5431_s3] sm:$0xff]  }
 0x813   : > { %3004 = vmatprep.subr.bf16.mxu0 %v4608_v42  ;;  %v4649_v42 = vld [vmem:[%s5431_s3 + $0x48] sm:$0xff]  }
 0x816   : > { %3005 = vmatpush1.bf16.msra.mxu0 %v4606_v55  ;;  %v4651_v55 = vld [vmem:[%s5431_s3 + $0x8] sm:$0xff]  }
 0x817   : > { %3006 = vmatprep.subr.bf16.mxu0 %v4614_v15  ;;  %v4653_v15 = vld [vmem:[%s5431_s3 + $0x50] sm:$0xff]  }
 0x81a   : > { %3007 = vmatpush1.bf16.msra.mxu0 %v4612_v58  ;;  %v4655_v58 = vld [vmem:[%s5431_s3 + $0x10] sm:$0xff]  }
 0x81b   : > { %3008 = vmatprep.subr.bf16.mxu0 %v4620_v1  ;;  %v4657_v1 = vld [vmem:[%s5431_s3 + $0x58] sm:$0xff]  }
 0x81e   : > { %3009 = vmatpush1.bf16.msra.mxu0 %v4618_v60  ;;  %v4659_v60 = vld [vmem:[%s5431_s3 + $0x18] sm:$0xff]  }
 0x81f   : > { %3010 = vmatprep.subr.bf16.mxu0 %v4626_v61  ;;  %v4661_v61 = vld [vmem:[%s5431_s3 + $0x60] sm:$0xff]  }
 0x822   : > { %3011 = vmatpush1.bf16.msra.mxu0 %v4624_v7  ;;  %v4663_v7 = vld [vmem:[%s5431_s3 + $0x20] sm:$0xff]  }
 0x823   : > { %3012 = vmatprep.subr.bf16.mxu0 %v4632_v8  ;;  %v4665_v8 = vld [vmem:[%s5431_s3 + $0x68] sm:$0xff]  }
 0x826   : > { %3013 = vmatpush1.bf16.msra.mxu0 %v4630_v12  ;;  %v4667_v12 = vld [vmem:[%s5431_s3 + $0x28] sm:$0xff]  }
 0x827   : > { %3014 = vmatprep.subr.bf16.mxu0 %v4638_v62  ;;  %v4669_v62 = vld [vmem:[%s5431_s3 + $0x70] sm:$0xff]  }
 0x82a   : > { %3015 = vmatpush1.bf16.msra.mxu0 %v4636_v17  ;;  %v4671_v17 = vld [vmem:[%s5431_s3 + $0x30] sm:$0xff]  }
 0x82b   : > { %3016 = vmatprep.subr.bf16.mxu0 %v4644_v21  ;;  %v4673_v21 = vld [vmem:[%s5431_s3 + $0x78] sm:$0xff]  }
 0x82e   : > { %3017 = vmatpush1.bf16.msra.mxu0 %v4642_v48  ;;  %v4675_v48 = vld [vmem:[%s5431_s3 + $0x38] sm:$0xff]  }
 0x8e4   : > { %v2681_v39 = vpop.f32.mrb[28].mxu0 }
 0x8e5   : > { %v2682_v43 = vadd.f32 %v3779_v38, %v2681_v39  ;;  %v4122_v44 = vpop.f32.mrb[29].mxu0 }
 0x8e6   : > { %v2684_v45 = vpop.f32.mrb[30].mxu0 }
 0x8e7   : > { %v5733_v47 = vadd.f32 %v4741_v46, %v2682_v43  ;;  %v2685_v28 = vadd.f32 %v3779_v38, %v2684_v45  ;;  %v4123_v54 = vpop.f32.mrb[31].mxu0 }
 0x8e8   : > { %v3788_v54 = vld [vmem:[%s761_s20] ss:$0 sm:$0xff] }
 0x8e9   : > { %v5735_v0 = vadd.f32 %v4742_v63, %v2685_v28  ;;  %2692 = vadd.xlane.f32.xlu0 %v5733_v47 }
 0x8eb   : > { %2694 = vadd.xlane.f32.xlu1 %v5735_v0 }
 0x976   : > { %v2693_v29 = vpop.xlane.xlu0 %2692 }
 0x977   : > { %v2696_v10 = vmul.f32 0.0078125, %v2693_v29 }
 0x978   : > { %v2695_v23 = vpop.xlane.xlu1 %2694 }
 0x979   : > { %v5740_v40 = vsub.f32 %v5733_v47, %v2696_v10  ;;  %v2697_v49 = vmul.f32 0.0078125, %v2695_v23 }
 0x97b   : > { %v5743_v50 = vsub.f32 %v5735_v0, %v2697_v49  ;;  %v2700_v51 = vmul.f32 %v5740_v40, %v5740_v40  ;;  %v2732_v29 = vmul.f32 %v3788_v54, %v5740_v40  ;;  %v4645_v40 = vld [vmem:[%s5431_s3 + $0x40] sm:$0xff]  }
 0x97c   : > { %3928 = vmatprep.subr.bf16.mxu1 %v4645_v40 }
 0x97d   : > { %2702 = vadd.xlane.f32.xlu0 %v2700_v51  ;;  %v2701_v52 = vmul.f32 %v5743_v50, %v5743_v50  ;;  %v2733_v10 = vmul.f32 %v3788_v54, %v5743_v50  ;;  %v3789_v51 = vld [vmem:[%s764_s26] ss:$0 sm:$0xff]  ;;  %v4646_v50 = vld [vmem:[%s5431_s3 + $0xc0] sm:$0xff]   ;;  %s5027_s26 = smov [#allocation11]  }
 0x97e   : > { %3950 = vmatprep.subr.bf16.mxu0 %v4646_v50  ;;  %s3479_s6 = sshll.u32 %s5027_s26, 4  ;;  %s3480_s6 = int_to_ptr.vmem [resolvable:$true] %s3479_s6 }
 0x97f   : > { %2704 = vadd.xlane.f32.xlu1 %v2701_v52  ;;  %s4919_s27 = scalar_lea.vmem %s3480_s6, 256  ;;  %p4926_p5 = scmp.lt.s32.totalorder %s3480_s6, %s3480_s6 }
 0x980   : > { %p4920_p4 = scmp.ne.s32.totalorder %s3480_s6, %s4919_s27  ;;  %p4927_p1 = scmp.lt.s32.totalorder %s4919_s27, %s4919_s27 }
 0x982   : > { %p4921_p8 = pnand %p4920_p4, %p4181_p6  ;;  %p4928_p12 = por %p4927_p1, %p4926_p5 }
 0x984   : > { %p4922_p13 = pneg %p4921_p8 }
 0x986   : > { %p4929_p11 = pnand %p4928_p12, %p4922_p13 }
 0xa0a   : > { %v2703_v14 = vpop.xlane.xlu0 %2702 }
 0xa0b   : > { %v2706_v22 = vmul.f32 0.007874016, %v2703_v14  ;;  %v4676_v14 = vld [vmem:[%s5431_s3 + $0xb8] sm:$0xff]  }
 0xa0c   : > { %v2705_v27 = vpop.xlane.xlu1 %2704 }
 0xa0d   : > { %4717 = vrsqrt.f32 %v2706_v22  ;;  %v2707_v33 = vmul.f32 0.007874016, %v2705_v27  ;;  %vm2710_vm7 = vcmp.eq.f32.partialorder %v2706_v22, inf  ;;  %v2713_v34 = vand.u32 2147483648, %v2706_v22 }
 0xa0e   : > { %vm2712_vm8 = vcmp.eq.f32.partialorder %v2706_v22, 0.0  ;;  %v2793_v27 = vsub.s32 3, %v5495_v2 }
 0xa0f   : > { %4719 = vrsqrt.f32 %v2707_v33  ;;  %vm2717_vm9 = vcmp.eq.f32.partialorder %v2707_v33, inf  ;;  %v2720_v44 = vand.u32 2147483648, %v2707_v33  ;;  %vm2719_vm10 = vcmp.eq.f32.partialorder %v2707_v33, 0.0 }
 0xa17   : > { %v4718_v30 = vpop.eup %4717 }
 0xa18   : > { %v2709_v32 = vmul.f32 %v4718_v30, %v2706_v22 }
 0xa19   : > { %v4720_v35 = vpop.eup %4719 }
 0xa1a   : > { %v2711_v26 = vsel %vm2710_vm7, %v2706_v22, %v2709_v32  ;;  %v2716_v39 = vmul.f32 %v4720_v35, %v2707_v33  ;;  %v2777_v22 = vld [vmem:[%s5413_s13] sm:$0xf] }
 0xa1b   : > { %v2714_v38 = vsel %vm2712_vm8, %v2713_v34, %v2711_v26  ;;  %v2790_v30 = vrot.slane %v2777_v22, %v880_v4  ;;  %v2786_v32 = vrot.slane %v2777_v22, %v876_v6  ;;  %v2794_v34 = vrot.slane %v2777_v22, %v2793_v27 }
 0xa1c   : > { %v2722_v43 = vadd.f32 1e-06, %v2714_v38  ;;  %v2718_v45 = vsel %vm2717_vm9, %v2707_v33, %v2716_v39  ;;  %v2782_v33 = vrot.slane %v2777_v22, %v872_v3 }
 0xa1d   : > { %v2721_v46 = vsel %vm2719_vm10, %v2720_v44, %v2718_v45 }
 0xa1e   : > { %4721 = vrcp.f32 %v2722_v43  ;;  %v2723_v28 = vadd.f32 1e-06, %v2721_v46 }
 0xa20   : > { %4723 = vrcp.f32 %v2723_v28 }
 0xa28   : > { %v4722_v63 = vpop.eup %4721 }
 0xa29   : > { %v2734_v23 = vmul.f32 %v4722_v63, %v2732_v29 }
 0xa2a   : > { %v4724_v49 = vpop.eup %4723 }
 0xa2b   : > { %v2735_v52 = vmul.f32 %v4724_v49, %v2733_v10  ;;  %v2742_v18 = vadd.f32 %v3789_v51, %v2734_v23 }
 0xa2d   : > { %v2743_v20 = vadd.f32 %v3789_v51, %v2735_v52 }
 0xa2f   : > { %v2744_v25 = vpack.c.bf16 %v2743_v20, %v2742_v18 }
 0xa31   : > { %2992 = vmatmul.mubr.bf16.vlgmr.msra.gmra.mrb[44].mxu1 %v2744_v25  ;;  %3035 = vmatmul.mubr.bf16.vlgmr.msra.gmra.mrb[32].mxu0 %v2744_v25 }
 0xa32   : > { %3929 = vmatpush3.bf16.msra.mxu1 %v4647_v31  ;;  %3951 = vmatpush3.bf16.msra.mxu0 %v4648_v36 }
 0xa33   : > { %3930 = vmatprep.subr.bf16.mxu1 %v4649_v42  ;;  %3952 = vmatprep.subr.bf16.mxu0 %v4650_v53 }
 0xa36   : > { %3931 = vmatpush3.bf16.msra.mxu1 %v4651_v55  ;;  %3953 = vmatpush3.bf16.msra.mxu0 %v4652_v56 }
 0xa37   : > { %3932 = vmatprep.subr.bf16.mxu1 %v4653_v15  ;;  %3954 = vmatprep.subr.bf16.mxu0 %v4654_v57 }
 0xa3a   : > { %3933 = vmatpush3.bf16.msra.mxu1 %v4655_v58  ;;  %3955 = vmatpush3.bf16.msra.mxu0 %v4656_v37 }
 0xa3b   : > { %3934 = vmatprep.subr.bf16.mxu1 %v4657_v1  ;;  %3956 = vmatprep.subr.bf16.mxu0 %v4658_v59 }
 0xa3e   : > { %3935 = vmatpush3.bf16.msra.mxu1 %v4659_v60  ;;  %3957 = vmatpush3.bf16.msra.mxu0 %v4660_v24 }
 0xa3f   : > { %3936 = vmatprep.subr.bf16.mxu1 %v4661_v61  ;;  %3958 = vmatprep.subr.bf16.mxu0 %v4662_v5 }
 0xa42   : > { %3937 = vmatpush3.bf16.msra.mxu1 %v4663_v7  ;;  %3959 = vmatpush3.bf16.msra.mxu0 %v4664_v41 }
 0xa43   : > { %3938 = vmatprep.subr.bf16.mxu1 %v4665_v8  ;;  %3960 = vmatprep.subr.bf16.mxu0 %v4666_v9 }
 0xa46   : > { %3939 = vmatpush3.bf16.msra.mxu1 %v4667_v12  ;;  %3961 = vmatpush3.bf16.msra.mxu0 %v4668_v13 }
 0xa47   : > { %3940 = vmatprep.subr.bf16.mxu1 %v4669_v62  ;;  %3962 = vmatprep.subr.bf16.mxu0 %v4670_v16 }
 0xa4a   : > { %3941 = vmatpush3.bf16.msra.mxu1 %v4671_v17  ;;  %3963 = vmatpush3.bf16.msra.mxu0 %v4672_v19 }
 0xa4b   : > { %3942 = vmatprep.subr.bf16.mxu1 %v4673_v21  ;;  %3964 = vmatprep.subr.bf16.mxu0 %v4674_v11 }
 0xa4e   : > { %3943 = vmatpush3.bf16.msra.mxu1 %v4675_v48  ;;  %3965 = vmatpush3.bf16.msra.mxu0 %v4676_v14 }
 0xb04   : > { %v2993_v35 = vpop.f32.mrb[44].mxu1  ;;  %v3036_v26 = vpop.f32.mrb[32].mxu0 }
 0xb05   : > { %v5833_v38 = vadd.f32 %v2993_v35, %v2782_v33  ;;  %v5835_v39 = vadd.f32 %v3036_v26, %v2790_v30  ;;  %v2995_v43 = vpop.f32.mrb[45].mxu1  ;;  %v3038_v44 = vpop.f32.mrb[33].mxu0 }
 0xb06   : > { %v5837_v45 = vadd.f32 %v2995_v43, %v2786_v32  ;;  %v5839_v46 = vadd.f32 %v3038_v44, %v2794_v34  ;;  %v2997_v3 = vpop.f32.mrb[46].mxu1  ;;  %v3040_v28 = vpop.f32.mrb[34].mxu0 }
 0xb07   : > { %v3053_v4 = vmul.f32 0.044715, %v5833_v38  ;;  %v3055_v2 = vmul.f32 0.044715, %v5835_v39  ;;  %v2998_v6 = vadd.f32 %v2997_v3, %v2782_v33  ;;  %v3041_v54 = vadd.f32 %v3040_v28, %v2790_v30  ;;  %v2999_v63 = vpop.f32.mrb[47].mxu1  ;;  %v3042_v29 = vpop.f32.mrb[35].mxu0 }
 0xb08   : > { %v3054_v10 = vmul.f32 0.044715, %v5837_v45  ;;  %v3056_v23 = vmul.f32 0.044715, %v5839_v46  ;;  %v5845_v49 = vadd.f32 %v2999_v63, %v2786_v32  ;;  %v5847_v51 = vadd.f32 %v3042_v29, %v2794_v34 }
 0xb09   : > { %v3061_v52 = vmul.f32 %v3053_v4, %v5833_v38  ;;  %v3063_v18 = vmul.f32 %v3055_v2, %v5835_v39  ;;  %v3057_v20 = vmul.f32 0.044715, %v2998_v6  ;;  %v3059_v25 = vmul.f32 0.044715, %v3041_v54 }
 0xb0a   : > { %v3062_v40 = vmul.f32 %v3054_v10, %v5837_v45  ;;  %v3064_v50 = vmul.f32 %v3056_v23, %v5839_v46  ;;  %v3058_v31 = vmul.f32 0.044715, %v5845_v49  ;;  %v3060_v36 = vmul.f32 0.044715, %v5847_v51 }
 0xb0b   : > { %v3069_v42 = vmul.f32 %v3061_v52, %v5833_v38  ;;  %v3071_v53 = vmul.f32 %v3063_v18, %v5835_v39  ;;  %v3065_v55 = vmul.f32 %v3057_v20, %v2998_v6  ;;  %v3067_v56 = vmul.f32 %v3059_v25, %v3041_v54 }
 0xb0c   : > { %v3070_v15 = vmul.f32 %v3062_v40, %v5837_v45  ;;  %v3072_v57 = vmul.f32 %v3064_v50, %v5839_v46  ;;  %v3066_v58 = vmul.f32 %v3058_v31, %v5845_v49  ;;  %v3068_v37 = vmul.f32 %v3060_v36, %v5847_v51 }
 0xb0d   : > { %v3077_v1 = vadd.f32 %v3069_v42, %v5833_v38  ;;  %v3079_v59 = vadd.f32 %v3071_v53, %v5835_v39  ;;  %v3073_v60 = vmul.f32 %v3065_v55, %v2998_v6  ;;  %v3075_v24 = vmul.f32 %v3067_v56, %v3041_v54 }
 0xb0e   : > { %v3074_v61 = vmul.f32 %v3066_v58, %v5845_v49  ;;  %v3076_v5 = vmul.f32 %v3068_v37, %v5847_v51  ;;  %v3078_v12 = vadd.f32 %v3070_v15, %v5837_v45  ;;  %v3080_v17 = vadd.f32 %v3072_v57, %v5839_v46 }
 0xb0f   : > { %v3085_v7 = vmul.f32 0.7978846, %v3077_v1  ;;  %v3087_v41 = vmul.f32 0.7978846, %v3079_v59  ;;  %v3081_v8 = vadd.f32 %v3073_v60, %v2998_v6  ;;  %v3083_v9 = vadd.f32 %v3075_v24, %v3041_v54 }
 0xb10   : > { %v3082_v13 = vadd.f32 %v3074_v61, %v5845_v49  ;;  %v3086_v19 = vmul.f32 0.7978846, %v3078_v12  ;;  %v3084_v11 = vadd.f32 %v3076_v5, %v5847_v51  ;;  %v3088_v48 = vmul.f32 0.7978846, %v3080_v17 }
 0xb11   : > { %4725 = vtanh.f32 %v3085_v7  ;;  %v3089_v62 = vmul.f32 0.7978846, %v3081_v8  ;;  %v3091_v16 = vmul.f32 0.7978846, %v3083_v9  ;;  %v3045_v35 = vmul.f32 0.5, %v5833_v38 }
 0xb12   : > { %4727 = vtanh.f32 %v3087_v41  ;;  %v3090_v21 = vmul.f32 0.7978846, %v3082_v13  ;;  %v3092_v14 = vmul.f32 0.7978846, %v3084_v11  ;;  %v3049_v26 = vmul.f32 0.5, %v2998_v6 }
 0xb13   : > { %4729 = vtanh.f32 %v3089_v62  ;;  %v3047_v3 = vmul.f32 0.5, %v5835_v39  ;;  %v3051_v28 = vmul.f32 0.5, %v3041_v54  ;;  %v3046_v63 = vmul.f32 0.5, %v5837_v45 }
 0xb14   : > { %4731 = vtanh.f32 %v3091_v16  ;;  %v3050_v18 = vmul.f32 0.5, %v5845_v49  ;;  %v3048_v6 = vmul.f32 0.5, %v5839_v46  ;;  %v3052_v50 = vmul.f32 0.5, %v5847_v51  ;;  %v3822_v46 = vld [vmem:[%s758_s14] ss:$0 sm:$0xff] }
 0xb15   : > { %4733 = vtanh.f32 %v3086_v19 }
 0xb16   : > { %4735 = vtanh.f32 %v3090_v21 }
 0xb17   : > { %4737 = vtanh.f32 %v3088_v48 }
 0xb18   : > { %4739 = vtanh.f32 %v3092_v14 }
 0xb1b   : > { %v4726_v22 = vpop.eup %4725 }
 0xb1c   : > { %v4728_v27 = vpop.eup %4727  ;;  %v3101_v33 = vadd.f32 1.0, %v4726_v22 }
 0xb1d   : > { %v4730_v30 = vpop.eup %4729  ;;  %v3103_v32 = vadd.f32 1.0, %v4728_v27 }
 0xb1e   : > { %v4732_v34 = vpop.eup %4731  ;;  %v3105_v43 = vadd.f32 1.0, %v4730_v30  ;;  %v3109_v10 = vmul.f32 %v3101_v33, %v3045_v35 }
 0xb1f   : > { %v4734_v44 = vpop.eup %4733  ;;  %v3107_v4 = vadd.f32 1.0, %v4732_v34  ;;  %v3111_v25 = vmul.f32 %v3103_v32, %v3047_v3 }
 0xb20   : > { %v4736_v2 = vpop.eup %4735  ;;  %v3102_v29 = vadd.f32 1.0, %v4734_v44  ;;  %v3113_v23 = vmul.f32 %v3105_v43, %v3049_v26 }
 0xb21   : > { %v4738_v52 = vpop.eup %4737  ;;  %v3106_v20 = vadd.f32 1.0, %v4736_v2  ;;  %v3115_v40 = vmul.f32 %v3107_v4, %v3051_v28 }
 0xb22   : > { %v4740_v38 = vpop.eup %4739  ;;  %v3104_v39 = vadd.f32 1.0, %v4738_v52  ;;  %v3117_v54 = vpack.c.bf16 %v3113_v23, %v3109_v10  ;;  %v3110_v31 = vmul.f32 %v3102_v29, %v3046_v63 }
 0xb23   : > { %v3114_v36 = vmul.f32 %v3106_v20, %v3050_v18  ;;  %v3108_v45 = vadd.f32 1.0, %v4740_v38  ;;  %v3119_v42 = vpack.c.bf16 %v3115_v40, %v3111_v25 }
 0xb24   : > { %v3112_v55 = vmul.f32 %v3104_v39, %v3048_v6 }
 0xb25   : > { %v3118_v53 = vpack.c.bf16 %v3114_v36, %v3110_v31  ;;  %v3116_v56 = vmul.f32 %v3108_v45, %v3052_v50 }
 0xb27   : > { %3416 = vmatprep.mubr.bf16.mxu1 %v3118_v53  ;;  %v3120_v49 = vpack.c.bf16 %v3116_v56, %v3112_v55 }
 0xb28   : > { %3417 = vmatmul.mubr.bf16.vlgmr.msra.gmra.mrb[48].mxu1 %v3117_v54 }
 0xb29   : > { %3457 = vmatprep.mubr.bf16.mxu0 %v3120_v49 }
 0xb2a   : > { %3458 = vmatmul.mubr.bf16.vlgmr.msra.gmra.mrb[36].mxu0 %v3119_v42 }
 0xbfb   : > { %v3944_v15 = vpop.f32.mrb[48].mxu1 }
 0xbfc   : > { %v3945_v51 = vpop.f32.mrb[49].mxu1 }
 0xbfd   : > { %v3966_v57 = vpop.f32.mrb[36].mxu0  ;;  %v3946_v58 = vadd.f32 %v3945_v51, %v3944_v15  ;;  %v3947_v37 = vpop.f32.mrb[50].mxu1 }
 0xbfe   : > { %v3967_v1 = vpop.f32.mrb[37].mxu0  ;;  %v3948_v59 = vpop.f32.mrb[51].mxu1 }
 0xbff   : > { %v3419_v60 = vadd.f32 %v3946_v58, %v3822_v46  ;;  %v3968_v24 = vadd.f32 %v3967_v1, %v3966_v57  ;;  %v3969_v61 = vpop.f32.mrb[38].mxu0  ;;  %v3949_v5 = vadd.f32 %v3948_v59, %v3947_v37 }
 0xc00   : > { %v3970_v7 = vpop.f32.mrb[39].mxu0 }
 0xc01   : > { %v3460_v41 = vadd.f32 %v3968_v24, %v3419_v60  ;;  %v3422_v8 = vadd.f32 %v3949_v5, %v3822_v46  ;;  %v3971_v9 = vadd.f32 %v3970_v7, %v3969_v61 }
 0xc03   : > { %v3466_v12 = vadd.f32 %v3460_v41, %v5733_v47  ;;  %v3463_v13 = vadd.f32 %v3971_v9, %v3422_v8 }
 0xc05   : > { %3468 = vst [vmem:[#allocation11] sm:$0xff] %v3466_v12  ;;  %v3467_v62 = vadd.f32 %v3463_v13, %v5735_v0 }
 0xc07   : > { %3469 = vst [vmem:[#allocation11 + $0x8] sm:$0xff] %v3467_v62 }
 0xc08   : > { %4932 = shalt.err (!%p4929_p11)
}
 0xc09   : > { %s6016_s3 = sld [smem:[#allocation32_spill]] }
 0xc0f   : > { %s4933_s1 = scalar_lea.hbm %s6016_s3, 256 }
 0xc10   : > { %p4934_p0 = scmp.ne.s32.totalorder %s6016_s3, %s4933_s1  ;;  %p4939_p2 = scmp.lt.u32.totalorder %s4933_s1, %s6016_s3 }
 0xc12   : > { %p4935_p7 = pnand %p4934_p0, %p4181_p6 }
 0xc14   : > { %p4936_p9 = pneg %p4935_p7 }
 0xc16   : > { %p4941_p10 = pnand %p4939_p2, %p4936_p9 }
 0xc18   : > { %4944 = shalt.err (!%p4941_p10)
}
 0xc19   : > { %s5028_s2 = smov 128   ;;  %s5029_s7 = smov 8  }
 0xc1a   : > { %4153 = dma.vmem_to_hbm [thread:$0]  (%p4181_p6), %s3480_s6, 256, %s6016_s3, [#allocation4], %s5028_s2, %s5028_s2, %s5029_s7  }
 0xc1b   : > { %4982 = dma.done.wait (%p4181_p6), [#allocation4], 256  }
 0xc1c   : > { %4984 = vsyncadd (%p4181_p6), [#allocation4], 4294967040 }
 0xc1d PF: > { %s27_s18 = sadd.s32 1, %s5007_s18   ;;  %s6017_s4 = sld [smem:[#allocation18_spill]] }
 0xc1e   : > { %p24_p3 = scmp.ge.s32.totalorder %s27_s18, 4   ;;  %s6018_s16 = sld [smem:[#allocation16_spill]] }
 0xc1f   : > { %s6019_s17 = sld [smem:[#allocation17_spill]]  ;;  %s6020_s29 = smov %s4991_s30 }
 0xc20   : > { %s6021_s30 = smov %s4995_s15  ;;  %26 = sbr.rel (!%p24_p3) target bundleno = 20 (0x14), region = 184 }
 0xc23   : > { %s6022_s15 = smov %s6017_s4 }
 0xc27   :  { %3495 = vsyncpa [#allocation3], 1 }
 0xc28   :  { %3497 = vsyncpa [#allocation3 + $0x1], 1 }
 0xc29   :  { %3498 = vsyncpa [#allocation6], 1 }
 0xc2a   :  { %3499 = vsyncpa [#allocation4], 1 }
 0xc2b   :  { %3501 = vsyncpa [#allocation4 + $0x1], 1 }

</bundles_post_ra>
